<compile_context>
chip_gen: v7x
topology: tpu7x:2x2x1
jax: 0.10.0
libtpu: 0.0.40
codegen_flags: <defaults>
</compile_context>

<pallas_src>
import functools
import math

import jax
import jax.numpy as jnp
from jax.experimental import pallas as pl
from jax.experimental.pallas import tpu as pltpu

# ---------------- model sizes (small synthetic "BERT") ----------------
BATCH = 2
SEQ = 8
HIDDEN = 32          # stands in for 768
NUM_HEADS = 4
HEAD_DIM = HIDDEN // NUM_HEADS
FFN = 4 * HIDDEN
NUM_LAYERS = 2
VOCAB = 64
NUM_CLASSES = 4
LN_EPS = 1e-12

_MXU = jnp.bfloat16        # matmul-input / stored-activation dtype
_F32 = jnp.float32         # accumulation / epilogue dtype
_VMEM_LIMIT = 32 * 1024 * 1024   # safe on v5e/v6e (128 MiB) and v7x (64 MiB)


# ---------------------------- in-kernel helpers ----------------------------
def _layernorm(z, g, b):
    mu = jnp.mean(z, axis=-1, keepdims=True)
    var = jnp.mean((z - mu) * (z - mu), axis=-1, keepdims=True)
    return (z - mu) * jax.lax.rsqrt(var + LN_EPS) * g + b


def _gelu_tanh(y):
    # TODO(synk): tanh-approx GELU; PyTorch nn.GELU default is the erf form.
    c = math.sqrt(2.0 / math.pi)
    return 0.5 * y * (1.0 + jnp.tanh(c * (y + 0.044715 * y * y * y)))


# ---------------------------- Pallas kernels ----------------------------
def _encoder_stack_kernel(emb_ref, mask_ref, embg_ref, embb_ref,
                          wqkv_ref, bqkv_ref, wo_ref, bo_ref,
                          ln1g_ref, ln1b_ref,
                          w1_ref, b1_ref, w2_ref, b2_ref,
                          ln2g_ref, ln2b_ref,
                          cls_ref, h_scr, *, num_heads, head_dim):
    """One grid step = one encoder layer for one batch element.

    The running hidden state [S, H] stays in VMEM scratch across the layer
    grid axis; the embedding LayerNorm seeds it at layer 0 and only the CLS
    row is written out at the last layer.
    """
    l = pl.program_id(1)
    H = num_heads * head_dim
    scale = 1.0 / math.sqrt(head_dim)

    # --- layer 0: embedding LayerNorm seeds the resident hidden state ---
    @pl.when(l == 0)
    def _():
        z = emb_ref[0].astype(_F32)
        h_scr[...] = _layernorm(z, embg_ref[...], embb_ref[...]).astype(_MXU)

    x_bf = h_scr[...]                            # [S, H] bf16
    x_f32 = x_bf.astype(_F32)

    # --- fused QKV projection: one [S,H] @ [H,3H] MXU pass (f32 accumulate) ---
    qkv = jnp.dot(x_bf, wqkv_ref[0], preferred_element_type=jnp.float32)
    qkv = qkv + bqkv_ref[0]                      # [S, 3H] f32

    # --- additive attention-mask bias rebuilt on-chip (stays f32) ---
    bias = (1.0 - mask_ref[0]) * -1e9            # [1, S], broadcasts over queries

    # --- per-head attention (static unroll; head_dim slices are vreg slices) ---
    ctx_heads = []
    for hd in range(num_heads):
        q = qkv[:, hd * head_dim:(hd + 1) * head_dim].astype(_MXU)
        k = qkv[:, H + hd * head_dim:H + (hd + 1) * head_dim].astype(_MXU)
        v = qkv[:, 2 * H + hd * head_dim:2 * H + (hd + 1) * head_dim].astype(_MXU)
        s = jax.lax.dot_general(q, k, (((1,), (1,)), ((), ())),
                                preferred_element_type=jnp.float32)
        s = s * scale + bias                     # [S, S] f32
        m = jnp.max(s, axis=-1, keepdims=True)
        p = jnp.exp(s - m)
        p = p * pl.reciprocal(jnp.sum(p, axis=-1, keepdims=True), approx=True)
        ctx_heads.append(jnp.dot(p.astype(_MXU), v,
                                 preferred_element_type=jnp.float32))
    ctx = jnp.concatenate(ctx_heads, axis=-1)    # [S, H] f32, lane-dense

    # --- output projection + residual + LayerNorm ---
    attn_out = jnp.dot(ctx.astype(_MXU), wo_ref[0],
                       preferred_element_type=jnp.float32) + bo_ref[0]
    h1 = _layernorm(attn_out + x_f32, ln1g_ref[0], ln1b_ref[0])

    # --- FFN (up + GELU, down) + residual + LayerNorm ---
    ff = jnp.dot(h1.astype(_MXU), w1_ref[0],
                 preferred_element_type=jnp.float32) + b1_ref[0]
    ff = _gelu_tanh(ff)
    y = jnp.dot(ff.astype(_MXU), w2_ref[0],
                preferred_element_type=jnp.float32) + b2_ref[0]
    h2 = _layernorm(y + h1, ln2g_ref[0], ln2b_ref[0])

    h_scr[...] = h2.astype(_MXU)                 # carried to next layer

    # --- only the CLS token is needed downstream ---
    @pl.when(l == pl.num_programs(1) - 1)
    def _():
        cls_ref[0] = h2[0:1, :].astype(cls_ref.dtype)


def _head_kernel(x_ref, wp_ref, bp_ref, wc_ref, bc_ref, o_ref):
    """Fused pooler (tanh linear on CLS) + classifier Linear + Softmax(dim=1)."""
    x = x_ref[...]                                               # [B, H] bf16
    pooled = jnp.dot(x, wp_ref[...], preferred_element_type=jnp.float32)
    pooled = jnp.tanh(pooled + bp_ref[...])
    logits = jnp.dot(pooled.astype(_MXU), wc_ref[...],
                     preferred_element_type=jnp.float32) + bc_ref[...]
    m = jnp.max(logits, axis=-1, keepdims=True)
    e = jnp.exp(logits - m)
    # exact divide so probabilities sum to 1 within f32 rounding
    o_ref[...] = e / jnp.sum(e, axis=-1, keepdims=True)


# ---------------------------- wrappers ----------------------------
def bert_encoder_stack(emb, mask3, p):
    """Embedding LN + all encoder layers in one pallas_call; returns CLS [B,1,H]."""
    B, S, H = emb.shape
    L = p["wqkv"].shape[0]

    def batch_spec(shape):            # indexed by batch grid axis
        nd = len(shape)
        return pl.BlockSpec((1,) + tuple(shape[1:]),
                            lambda b, l, _nd=nd: (b,) + (0,) * (_nd - 1))

    def layer_spec(arr):              # stacked per-layer weights, indexed by l
        nd = arr.ndim
        return pl.BlockSpec((1,) + tuple(arr.shape[1:]),
                            lambda b, l, _nd=nd: (l,) + (0,) * (_nd - 1))

    def shared_spec(arr):             # broadcast (embedding LN params)
        nd = arr.ndim
        return pl.BlockSpec(tuple(arr.shape), lambda b, l, _nd=nd: (0,) * _nd)

    return pl.pallas_call(
        functools.partial(_encoder_stack_kernel,
                          num_heads=NUM_HEADS, head_dim=HEAD_DIM),
        out_shape=jax.ShapeDtypeStruct((B, 1, H), _MXU),
        grid=(B, L),
        in_specs=[
            batch_spec((B, S, H)),                 # summed embeddings (f32)
            batch_spec((B, 1, S)),                 # padding mask
            shared_spec(p["emb_ln_g"]), shared_spec(p["emb_ln_b"]),
            layer_spec(p["wqkv"]), layer_spec(p["bqkv"]),
            layer_spec(p["wo"]), layer_spec(p["bo"]),
            layer_spec(p["ln1_g"]), layer_spec(p["ln1_b"]),
            layer_spec(p["w1"]), layer_spec(p["b1"]),
            layer_spec(p["w2"]), layer_spec(p["b2"]),
            layer_spec(p["ln2_g"]), layer_spec(p["ln2_b"]),
        ],
        out_specs=pl.BlockSpec((1, 1, H), lambda b, l: (b, 0, 0)),
        scratch_shapes=[pltpu.VMEM((S, H), _MXU)],   # resident hidden state
        compiler_params=pltpu.CompilerParams(
            dimension_semantics=("parallel", "arbitrary"),
            vmem_limit_bytes=_VMEM_LIMIT),
    )(emb, mask3, p["emb_ln_g"], p["emb_ln_b"],
      p["wqkv"], p["bqkv"], p["wo"], p["bo"],
      p["ln1_g"], p["ln1_b"], p["w1"], p["b1"], p["w2"], p["b2"],
      p["ln2_g"], p["ln2_b"])


def pooler_classifier_softmax(cls_tok, wp, bp, wc, bc):
    B, H = cls_tok.shape
    C = wc.shape[1]
    full = lambda shape: pl.BlockSpec(shape, lambda: tuple(0 for _ in shape))
    return pl.pallas_call(
        _head_kernel,
        out_shape=jax.ShapeDtypeStruct((B, C), jnp.float32),
        in_specs=[full((B, H)), full((H, H)), full((1, H)),
                  full((H, C)), full((1, C))],
        out_specs=full((B, C)),
        compiler_params=pltpu.CompilerParams(vmem_limit_bytes=_VMEM_LIMIT),
    )(cls_tok, wp, bp, wc, bc)


# ---------------------------- parameters ----------------------------
def init_params(key):
    def nrm(k, shape, std=0.02):
        return (std * jax.random.normal(k, shape, dtype=jnp.float32)).astype(_MXU)

    keys = iter(jax.random.split(key, 5 + NUM_LAYERS * 6))
    p = {
        "word_emb": 0.02 * jax.random.normal(next(keys), (VOCAB, HIDDEN), dtype=jnp.float32),
        "pos_emb": 0.02 * jax.random.normal(next(keys), (SEQ, HIDDEN), dtype=jnp.float32),
        "type_emb": 0.02 * jax.random.normal(next(keys), (2, HIDDEN), dtype=jnp.float32),
        "emb_ln_g": jnp.ones((1, HIDDEN), jnp.float32),
        "emb_ln_b": jnp.zeros((1, HIDDEN), jnp.float32),
        "pool_w": nrm(next(keys), (HIDDEN, HIDDEN)),
        "pool_b": jnp.zeros((1, HIDDEN), jnp.float32),
        "cls_w": nrm(next(keys), (HIDDEN, NUM_CLASSES)),
        "cls_b": jnp.zeros((1, NUM_CLASSES), jnp.float32),
    }
    wqkv, wo, w1, w2 = [], [], [], []
    for _ in range(NUM_LAYERS):
        wq = nrm(next(keys), (HIDDEN, HIDDEN))
        wk = nrm(next(keys), (HIDDEN, HIDDEN))
        wv = nrm(next(keys), (HIDDEN, HIDDEN))
        wqkv.append(jnp.concatenate([wq, wk, wv], axis=1))   # (H, 3H) bf16
        wo.append(nrm(next(keys), (HIDDEN, HIDDEN)))
        w1.append(nrm(next(keys), (HIDDEN, FFN)))
        w2.append(nrm(next(keys), (FFN, HIDDEN)))
    L = NUM_LAYERS
    p["wqkv"] = jnp.stack(wqkv)                               # (L, H, 3H) bf16
    p["bqkv"] = jnp.zeros((L, 1, 3 * HIDDEN), jnp.float32)
    p["wo"] = jnp.stack(wo)                                   # (L, H, H)
    p["bo"] = jnp.zeros((L, 1, HIDDEN), jnp.float32)
    p["ln1_g"] = jnp.ones((L, 1, HIDDEN), jnp.float32)
    p["ln1_b"] = jnp.zeros((L, 1, HIDDEN), jnp.float32)
    p["w1"] = jnp.stack(w1)                                   # (L, H, FFN)
    p["b1"] = jnp.zeros((L, 1, FFN), jnp.float32)
    p["w2"] = jnp.stack(w2)                                   # (L, FFN, H)
    p["b2"] = jnp.zeros((L, 1, HIDDEN), jnp.float32)
    p["ln2_g"] = jnp.ones((L, 1, HIDDEN), jnp.float32)
    p["ln2_b"] = jnp.zeros((L, 1, HIDDEN), jnp.float32)
    return p


# ---------------------------- forward ----------------------------
def bert_classifier_forward(params, ids, mask):
    B, S = ids.shape
    H = HIDDEN

    # --- embeddings: gather + add are XLA glue; LN is folded into the stack kernel ---
    emb = (params["word_emb"][ids]
           + params["pos_emb"][None, :S, :]
           + params["type_emb"][0][None, None, :])            # [B, S, H] f32
    mask3 = mask.astype(jnp.float32).reshape(B, 1, S)          # [B, 1, S]

    # --- single fused Pallas call for embedding LN + all encoder layers ---
    cls_tok = bert_encoder_stack(emb, mask3, params).reshape(B, H)   # [B, H] bf16

    # --- pooler + self.lin + self.out (Softmax(dim=1)), fused head ---
    return pooler_classifier_softmax(cls_tok,
                                     params["pool_w"], params["pool_b"],
                                     params["cls_w"], params["cls_b"])   # [B, 4]


# ---------------------------- main ----------------------------
if __name__ == "__main__":
    key = jax.random.PRNGKey(0)
    kp, ki = jax.random.split(key)
    params = init_params(kp)

    ids = jax.random.randint(ki, (BATCH, SEQ), 0, VOCAB, dtype=jnp.int32)
    # last two positions of the second example are padding
    mask = jnp.ones((BATCH, SEQ), jnp.int32).at[1, SEQ - 2:].set(0)

    probs = jax.jit(bert_classifier_forward)(params, ids, mask)
    probs = jax.block_until_ready(probs)

    assert probs.shape == (BATCH, NUM_CLASSES)
    assert bool(jnp.all(jnp.isfinite(probs)))
    assert bool(jnp.allclose(jnp.sum(probs, axis=1), 1.0, atol=1e-5))
    print("KERNEL_OK")
</pallas_src>

<mosaic_0001>
module attributes {stable_mosaic.version = 11 : i64} {
  func.func @_encoder_stack_kernel(%arg0: i32, %arg1: i32, %arg2: memref<1x8x32xf32, #tpu.memory_space<vmem>>, %arg3: memref<1x1x8xf32, #tpu.memory_space<vmem>>, %arg4: memref<1x32xf32, #tpu.memory_space<vmem>>, %arg5: memref<1x32xf32, #tpu.memory_space<vmem>>, %arg6: memref<1x32x96xbf16, #tpu.memory_space<vmem>>, %arg7: memref<1x1x96xf32, #tpu.memory_space<vmem>>, %arg8: memref<1x32x32xbf16, #tpu.memory_space<vmem>>, %arg9: memref<1x1x32xf32, #tpu.memory_space<vmem>>, %arg10: memref<1x1x32xf32, #tpu.memory_space<vmem>>, %arg11: memref<1x1x32xf32, #tpu.memory_space<vmem>>, %arg12: memref<1x32x128xbf16, #tpu.memory_space<vmem>>, %arg13: memref<1x1x128xf32, #tpu.memory_space<vmem>>, %arg14: memref<1x128x32xbf16, #tpu.memory_space<vmem>>, %arg15: memref<1x1x32xf32, #tpu.memory_space<vmem>>, %arg16: memref<1x1x32xf32, #tpu.memory_space<vmem>>, %arg17: memref<1x1x32xf32, #tpu.memory_space<vmem>>, %arg18: memref<1x1x32xbf16, #tpu.memory_space<vmem>>, %arg19: memref<8x32xbf16, #tpu.memory_space<vmem>>) attributes {dimension_semantics = [#tpu.dimension_semantics<parallel>, #tpu.dimension_semantics<arbitrary>], iteration_bounds = array<i64: 2, 2>, scalar_prefetch = 0 : i64, scratch_operands = 1 : i64, tpu.core_type = #tpu.core_type<tc>, window_params = [{transform_indices = @transform_0, window_bounds = array<i64: 1, 8, 32>}, {transform_indices = @transform_1, window_bounds = array<i64: 1, 1, 8>}, {pipeline_mode = #tpu.pipeline_mode<synchronous>, transform_indices = @transform_2, window_bounds = array<i64: 1, 32>}, {pipeline_mode = #tpu.pipeline_mode<synchronous>, transform_indices = @transform_3, window_bounds = array<i64: 1, 32>}, {transform_indices = @transform_4, window_bounds = array<i64: 1, 32, 96>}, {transform_indices = @transform_5, window_bounds = array<i64: 1, 1, 96>}, {transform_indices = @transform_6, window_bounds = array<i64: 1, 32, 32>}, {transform_indices = @transform_7, window_bounds = array<i64: 1, 1, 32>}, {transform_indices = @transform_8, window_bounds = array<i64: 1, 1, 32>}, {transform_indices = @transform_9, window_bounds = array<i64: 1, 1, 32>}, {transform_indices = @transform_10, window_bounds = array<i64: 1, 32, 128>}, {transform_indices = @transform_11, window_bounds = array<i64: 1, 1, 128>}, {transform_indices = @transform_12, window_bounds = array<i64: 1, 128, 32>}, {transform_indices = @transform_13, window_bounds = array<i64: 1, 1, 32>}, {transform_indices = @transform_14, window_bounds = array<i64: 1, 1, 32>}, {transform_indices = @transform_15, window_bounds = array<i64: 1, 1, 32>}, {transform_indices = @transform_16, window_bounds = array<i64: 1, 1, 32>}]} {
    %c0_i32 = arith.constant 0 : i32
    %0 = arith.cmpi eq, %arg1, %c0_i32 : i32
    %1 = arith.extui %0 : i1 to i32
    %c0_i32_0 = arith.constant 0 : i32
    %2 = arith.cmpi ne, %1, %c0_i32_0 : i32
    scf.if %2 {
      %c0_83 = arith.constant 0 : index
      %c0_84 = arith.constant 0 : index
      %c0_85 = arith.constant 0 : index
      %211 = vector.load %arg2[%c0_83, %c0_84, %c0_85] : memref<1x8x32xf32, #tpu.memory_space<vmem>>, vector<1x8x32xf32>
      %212 = vector.shape_cast %211 : vector<1x8x32xf32> to vector<8x32xf32>
      %c0_86 = arith.constant 0 : index
      %c0_87 = arith.constant 0 : index
      %213 = vector.load %arg4[%c0_86, %c0_87] : memref<1x32xf32, #tpu.memory_space<vmem>>, vector<1x32xf32>
      %c0_88 = arith.constant 0 : index
      %c0_89 = arith.constant 0 : index
      %214 = vector.load %arg5[%c0_88, %c0_89] : memref<1x32xf32, #tpu.memory_space<vmem>>, vector<1x32xf32>
      %cst_90 = arith.constant dense<0.000000e+00> : vector<8xf32>
      %215 = vector.multi_reduction <add>, %212, %cst_90 [1] : vector<8x32xf32> to vector<8xf32>
      %216 = vector.shape_cast %215 : vector<8xf32> to vector<8x1xf32>
      %cst_91 = arith.constant 3.200000e+01 : f32
      %217 = vector.broadcast %cst_91 : f32 to vector<8x1xf32>
      %218 = arith.divf %216, %217 : vector<8x1xf32>
      %219 = vector.broadcast %218 : vector<8x1xf32> to vector<8x32xf32>
      %220 = arith.subf %212, %219 : vector<8x32xf32>
      %221 = vector.broadcast %218 : vector<8x1xf32> to vector<8x32xf32>
      %222 = arith.subf %212, %221 : vector<8x32xf32>
      %223 = arith.mulf %220, %222 : vector<8x32xf32>
      %cst_92 = arith.constant dense<0.000000e+00> : vector<8xf32>
      %224 = vector.multi_reduction <add>, %223, %cst_92 [1] : vector<8x32xf32> to vector<8xf32>
      %225 = vector.shape_cast %224 : vector<8xf32> to vector<8x1xf32>
      %cst_93 = arith.constant 3.200000e+01 : f32
      %226 = vector.broadcast %cst_93 : f32 to vector<8x1xf32>
      %227 = arith.divf %225, %226 : vector<8x1xf32>
      %228 = vector.broadcast %218 : vector<8x1xf32> to vector<8x32xf32>
      %229 = arith.subf %212, %228 : vector<8x32xf32>
      %cst_94 = arith.constant 9.99999996E-13 : f32
      %230 = vector.broadcast %cst_94 : f32 to vector<8x1xf32>
      %231 = arith.addf %227, %230 : vector<8x1xf32>
      %232 = math.rsqrt %231 : vector<8x1xf32>
      %233 = vector.broadcast %232 : vector<8x1xf32> to vector<8x32xf32>
      %234 = arith.mulf %229, %233 : vector<8x32xf32>
      %235 = vector.broadcast %213 : vector<1x32xf32> to vector<8x32xf32>
      %236 = arith.mulf %234, %235 : vector<8x32xf32>
      %237 = vector.broadcast %214 : vector<1x32xf32> to vector<8x32xf32>
      %238 = arith.addf %236, %237 : vector<8x32xf32>
      %239 = arith.truncf %238 : vector<8x32xf32> to vector<8x32xbf16>
      %c0_95 = arith.constant 0 : index
      %c0_96 = arith.constant 0 : index
      %240 = vector.load %arg19[%c0_95, %c0_96] : memref<8x32xbf16, #tpu.memory_space<vmem>>, vector<8x32xbf16>
      tpu.vector_store %arg19[%c0_95, %c0_96], %239 {strides = array<i32>} : memref<8x32xbf16, #tpu.memory_space<vmem>>, vector<8x32xbf16>,
    } else {
    }
    %c0 = arith.constant 0 : index
    %c0_1 = arith.constant 0 : index
    %3 = vector.load %arg19[%c0, %c0_1] : memref<8x32xbf16, #tpu.memory_space<vmem>>, vector<8x32xbf16>
    %4 = arith.extf %3 : vector<8x32xbf16> to vector<8x32xf32>
    %c0_2 = arith.constant 0 : index
    %c0_3 = arith.constant 0 : index
    %c0_4 = arith.constant 0 : index
    %5 = vector.load %arg6[%c0_2, %c0_3, %c0_4] : memref<1x32x96xbf16, #tpu.memory_space<vmem>>, vector<1x32x96xbf16>
    %6 = vector.shape_cast %5 : vector<1x32x96xbf16> to vector<32x96xbf16>
    %cst = arith.constant dense<0.000000e+00> : vector<8x96xf32>
    %7 = tpu.matmul %3, %6, %cst {dimension_numbers = #tpu.dot_dimension_numbers<[1], [0], [0], [1], [0, 0, 1, 1], [], []>} : vector<8x32xbf16>, vector<32x96xbf16>, vector<8x96xf32> -> vector<8x96xf32>
    %c0_5 = arith.constant 0 : index
    %c0_6 = arith.constant 0 : index
    %c0_7 = arith.constant 0 : index
    %8 = vector.load %arg7[%c0_5, %c0_6, %c0_7] : memref<1x1x96xf32, #tpu.memory_space<vmem>>, vector<1x1x96xf32>
    %9 = vector.shape_cast %8 : vector<1x1x96xf32> to vector<1x96xf32>
    %10 = vector.broadcast %9 : vector<1x96xf32> to vector<8x96xf32>
    %11 = arith.addf %7, %10 : vector<8x96xf32>
    %c0_8 = arith.constant 0 : index
    %c0_9 = arith.constant 0 : index
    %c0_10 = arith.constant 0 : index
    %12 = vector.load %arg3[%c0_8, %c0_9, %c0_10] : memref<1x1x8xf32, #tpu.memory_space<vmem>>, vector<1x1x8xf32>
    %13 = vector.shape_cast %12 : vector<1x1x8xf32> to vector<1x8xf32>
    %cst_11 = arith.constant 1.000000e+00 : f32
    %14 = vector.broadcast %cst_11 : f32 to vector<1x8xf32>
    %15 = arith.subf %14, %13 : vector<1x8xf32>
    %cst_12 = arith.constant -1.000000e+09 : f32
    %16 = vector.broadcast %cst_12 : f32 to vector<1x8xf32>
    %17 = arith.mulf %15, %16 : vector<1x8xf32>
    %18 = vector.extract_strided_slice %11 {offsets = [0, 0], sizes = [8, 8], strides = [1, 1]} : vector<8x96xf32> to vector<8x8xf32>
    %19 = arith.truncf %18 : vector<8x8xf32> to vector<8x8xbf16>
    %20 = vector.extract_strided_slice %11 {offsets = [0, 32], sizes = [8, 8], strides = [1, 1]} : vector<8x96xf32> to vector<8x8xf32>
    %21 = arith.truncf %20 : vector<8x8xf32> to vector<8x8xbf16>
    %22 = vector.extract_strided_slice %11 {offsets = [0, 64], sizes = [8, 8], strides = [1, 1]} : vector<8x96xf32> to vector<8x8xf32>
    %23 = arith.truncf %22 : vector<8x8xf32> to vector<8x8xbf16>
    %cst_13 = arith.constant dense<0.000000e+00> : vector<8x8xf32>
    %24 = tpu.matmul %19, %21, %cst_13 {dimension_numbers = #tpu.dot_dimension_numbers<[1], [1], [0], [0], [0, 0, 1, 0], [], []>} : vector<8x8xbf16>, vector<8x8xbf16>, vector<8x8xf32> -> vector<8x8xf32>
    %cst_14 = arith.constant 0.353553385 : f32
    %25 = vector.broadcast %cst_14 : f32 to vector<8x8xf32>
    %26 = arith.mulf %24, %25 : vector<8x8xf32>
    %27 = vector.broadcast %17 : vector<1x8xf32> to vector<8x8xf32>
    %28 = arith.addf %26, %27 : vector<8x8xf32>
    %cst_15 = arith.constant dense<0xFF800000> : vector<8xf32>
    %29 = vector.multi_reduction <maximumf>, %28, %cst_15 [1] : vector<8x8xf32> to vector<8xf32>
    %30 = vector.shape_cast %29 : vector<8xf32> to vector<8x1xf32>
    %31 = vector.broadcast %30 : vector<8x1xf32> to vector<8x8xf32>
    %32 = arith.subf %28, %31 : vector<8x8xf32>
    %33 = math.exp %32 : vector<8x8xf32>
    %cst_16 = arith.constant dense<0.000000e+00> : vector<8xf32>
    %34 = vector.multi_reduction <add>, %33, %cst_16 [1] : vector<8x8xf32> to vector<8xf32>
    %35 = vector.shape_cast %34 : vector<8xf32> to vector<8x1xf32>
    %36 = tpu.reciprocal %35 {approx = true} : vector<8x1xf32> -> vector<8x1xf32>
    %37 = vector.broadcast %36 : vector<8x1xf32> to vector<8x8xf32>
    %38 = arith.mulf %33, %37 : vector<8x8xf32>
    %39 = arith.truncf %38 : vector<8x8xf32> to vector<8x8xbf16>
    %cst_17 = arith.constant dense<0.000000e+00> : vector<8x8xf32>
    %40 = tpu.matmul %39, %23, %cst_17 {dimension_numbers = #tpu.dot_dimension_numbers<[1], [0], [0], [1], [0, 0, 1, 1], [], []>} : vector<8x8xbf16>, vector<8x8xbf16>, vector<8x8xf32> -> vector<8x8xf32>
    %41 = vector.extract_strided_slice %11 {offsets = [0, 8], sizes = [8, 8], strides = [1, 1]} : vector<8x96xf32> to vector<8x8xf32>
    %42 = arith.truncf %41 : vector<8x8xf32> to vector<8x8xbf16>
    %43 = vector.extract_strided_slice %11 {offsets = [0, 40], sizes = [8, 8], strides = [1, 1]} : vector<8x96xf32> to vector<8x8xf32>
    %44 = arith.truncf %43 : vector<8x8xf32> to vector<8x8xbf16>
    %45 = vector.extract_strided_slice %11 {offsets = [0, 72], sizes = [8, 8], strides = [1, 1]} : vector<8x96xf32> to vector<8x8xf32>
    %46 = arith.truncf %45 : vector<8x8xf32> to vector<8x8xbf16>
    %cst_18 = arith.constant dense<0.000000e+00> : vector<8x8xf32>
    %47 = tpu.matmul %42, %44, %cst_18 {dimension_numbers = #tpu.dot_dimension_numbers<[1], [1], [0], [0], [0, 0, 1, 0], [], []>} : vector<8x8xbf16>, vector<8x8xbf16>, vector<8x8xf32> -> vector<8x8xf32>
    %cst_19 = arith.constant 0.353553385 : f32
    %48 = vector.broadcast %cst_19 : f32 to vector<8x8xf32>
    %49 = arith.mulf %47, %48 : vector<8x8xf32>
    %50 = vector.broadcast %17 : vector<1x8xf32> to vector<8x8xf32>
    %51 = arith.addf %49, %50 : vector<8x8xf32>
    %cst_20 = arith.constant dense<0xFF800000> : vector<8xf32>
    %52 = vector.multi_reduction <maximumf>, %51, %cst_20 [1] : vector<8x8xf32> to vector<8xf32>
    %53 = vector.shape_cast %52 : vector<8xf32> to vector<8x1xf32>
    %54 = vector.broadcast %53 : vector<8x1xf32> to vector<8x8xf32>
    %55 = arith.subf %51, %54 : vector<8x8xf32>
    %56 = math.exp %55 : vector<8x8xf32>
    %cst_21 = arith.constant dense<0.000000e+00> : vector<8xf32>
    %57 = vector.multi_reduction <add>, %56, %cst_21 [1] : vector<8x8xf32> to vector<8xf32>
    %58 = vector.shape_cast %57 : vector<8xf32> to vector<8x1xf32>
    %59 = tpu.reciprocal %58 {approx = true} : vector<8x1xf32> -> vector<8x1xf32>
    %60 = vector.broadcast %59 : vector<8x1xf32> to vector<8x8xf32>
    %61 = arith.mulf %56, %60 : vector<8x8xf32>
    %62 = arith.truncf %61 : vector<8x8xf32> to vector<8x8xbf16>
    %cst_22 = arith.constant dense<0.000000e+00> : vector<8x8xf32>
    %63 = tpu.matmul %62, %46, %cst_22 {dimension_numbers = #tpu.dot_dimension_numbers<[1], [0], [0], [1], [0, 0, 1, 1], [], []>} : vector<8x8xbf16>, vector<8x8xbf16>, vector<8x8xf32> -> vector<8x8xf32>
    %64 = vector.extract_strided_slice %11 {offsets = [0, 16], sizes = [8, 8], strides = [1, 1]} : vector<8x96xf32> to vector<8x8xf32>
    %65 = arith.truncf %64 : vector<8x8xf32> to vector<8x8xbf16>
    %66 = vector.extract_strided_slice %11 {offsets = [0, 48], sizes = [8, 8], strides = [1, 1]} : vector<8x96xf32> to vector<8x8xf32>
    %67 = arith.truncf %66 : vector<8x8xf32> to vector<8x8xbf16>
    %68 = vector.extract_strided_slice %11 {offsets = [0, 80], sizes = [8, 8], strides = [1, 1]} : vector<8x96xf32> to vector<8x8xf32>
    %69 = arith.truncf %68 : vector<8x8xf32> to vector<8x8xbf16>
    %cst_23 = arith.constant dense<0.000000e+00> : vector<8x8xf32>
    %70 = tpu.matmul %65, %67, %cst_23 {dimension_numbers = #tpu.dot_dimension_numbers<[1], [1], [0], [0], [0, 0, 1, 0], [], []>} : vector<8x8xbf16>, vector<8x8xbf16>, vector<8x8xf32> -> vector<8x8xf32>
    %cst_24 = arith.constant 0.353553385 : f32
    %71 = vector.broadcast %cst_24 : f32 to vector<8x8xf32>
    %72 = arith.mulf %70, %71 : vector<8x8xf32>
    %73 = vector.broadcast %17 : vector<1x8xf32> to vector<8x8xf32>
    %74 = arith.addf %72, %73 : vector<8x8xf32>
    %cst_25 = arith.constant dense<0xFF800000> : vector<8xf32>
    %75 = vector.multi_reduction <maximumf>, %74, %cst_25 [1] : vector<8x8xf32> to vector<8xf32>
    %76 = vector.shape_cast %75 : vector<8xf32> to vector<8x1xf32>
    %77 = vector.broadcast %76 : vector<8x1xf32> to vector<8x8xf32>
    %78 = arith.subf %74, %77 : vector<8x8xf32>
    %79 = math.exp %78 : vector<8x8xf32>
    %cst_26 = arith.constant dense<0.000000e+00> : vector<8xf32>
    %80 = vector.multi_reduction <add>, %79, %cst_26 [1] : vector<8x8xf32> to vector<8xf32>
    %81 = vector.shape_cast %80 : vector<8xf32> to vector<8x1xf32>
    %82 = tpu.reciprocal %81 {approx = true} : vector<8x1xf32> -> vector<8x1xf32>
    %83 = vector.broadcast %82 : vector<8x1xf32> to vector<8x8xf32>
    %84 = arith.mulf %79, %83 : vector<8x8xf32>
    %85 = arith.truncf %84 : vector<8x8xf32> to vector<8x8xbf16>
    %cst_27 = arith.constant dense<0.000000e+00> : vector<8x8xf32>
    %86 = tpu.matmul %85, %69, %cst_27 {dimension_numbers = #tpu.dot_dimension_numbers<[1], [0], [0], [1], [0, 0, 1, 1], [], []>} : vector<8x8xbf16>, vector<8x8xbf16>, vector<8x8xf32> -> vector<8x8xf32>
    %87 = vector.extract_strided_slice %11 {offsets = [0, 24], sizes = [8, 8], strides = [1, 1]} : vector<8x96xf32> to vector<8x8xf32>
    %88 = arith.truncf %87 : vector<8x8xf32> to vector<8x8xbf16>
    %89 = vector.extract_strided_slice %11 {offsets = [0, 56], sizes = [8, 8], strides = [1, 1]} : vector<8x96xf32> to vector<8x8xf32>
    %90 = arith.truncf %89 : vector<8x8xf32> to vector<8x8xbf16>
    %91 = vector.extract_strided_slice %11 {offsets = [0, 88], sizes = [8, 8], strides = [1, 1]} : vector<8x96xf32> to vector<8x8xf32>
    %92 = arith.truncf %91 : vector<8x8xf32> to vector<8x8xbf16>
    %cst_28 = arith.constant dense<0.000000e+00> : vector<8x8xf32>
    %93 = tpu.matmul %88, %90, %cst_28 {dimension_numbers = #tpu.dot_dimension_numbers<[1], [1], [0], [0], [0, 0, 1, 0], [], []>} : vector<8x8xbf16>, vector<8x8xbf16>, vector<8x8xf32> -> vector<8x8xf32>
    %cst_29 = arith.constant 0.353553385 : f32
    %94 = vector.broadcast %cst_29 : f32 to vector<8x8xf32>
    %95 = arith.mulf %93, %94 : vector<8x8xf32>
    %96 = vector.broadcast %17 : vector<1x8xf32> to vector<8x8xf32>
    %97 = arith.addf %95, %96 : vector<8x8xf32>
    %cst_30 = arith.constant dense<0xFF800000> : vector<8xf32>
    %98 = vector.multi_reduction <maximumf>, %97, %cst_30 [1] : vector<8x8xf32> to vector<8xf32>
    %99 = vector.shape_cast %98 : vector<8xf32> to vector<8x1xf32>
    %100 = vector.broadcast %99 : vector<8x1xf32> to vector<8x8xf32>
    %101 = arith.subf %97, %100 : vector<8x8xf32>
    %102 = math.exp %101 : vector<8x8xf32>
    %cst_31 = arith.constant dense<0.000000e+00> : vector<8xf32>
    %103 = vector.multi_reduction <add>, %102, %cst_31 [1] : vector<8x8xf32> to vector<8xf32>
    %104 = vector.shape_cast %103 : vector<8xf32> to vector<8x1xf32>
    %105 = tpu.reciprocal %104 {approx = true} : vector<8x1xf32> -> vector<8x1xf32>
    %106 = vector.broadcast %105 : vector<8x1xf32> to vector<8x8xf32>
    %107 = arith.mulf %102, %106 : vector<8x8xf32>
    %108 = arith.truncf %107 : vector<8x8xf32> to vector<8x8xbf16>
    %cst_32 = arith.constant dense<0.000000e+00> : vector<8x8xf32>
    %109 = tpu.matmul %108, %92, %cst_32 {dimension_numbers = #tpu.dot_dimension_numbers<[1], [0], [0], [1], [0, 0, 1, 1], [], []>} : vector<8x8xbf16>, vector<8x8xbf16>, vector<8x8xf32> -> vector<8x8xf32>
    %110 = tpu.concatenate %40, %63, %86, %109 in 1 : vector<8x8xf32>, vector<8x8xf32>, vector<8x8xf32>, vector<8x8xf32> -> vector<8x32xf32>
    %111 = arith.truncf %110 : vector<8x32xf32> to vector<8x32xbf16>
    %c0_33 = arith.constant 0 : index
    %c0_34 = arith.constant 0 : index
    %c0_35 = arith.constant 0 : index
    %112 = vector.load %arg8[%c0_33, %c0_34, %c0_35] : memref<1x32x32xbf16, #tpu.memory_space<vmem>>, vector<1x32x32xbf16>
    %113 = vector.shape_cast %112 : vector<1x32x32xbf16> to vector<32x32xbf16>
    %cst_36 = arith.constant dense<0.000000e+00> : vector<8x32xf32>
    %114 = tpu.matmul %111, %113, %cst_36 {dimension_numbers = #tpu.dot_dimension_numbers<[1], [0], [0], [1], [0, 0, 1, 1], [], []>} : vector<8x32xbf16>, vector<32x32xbf16>, vector<8x32xf32> -> vector<8x32xf32>
    %c0_37 = arith.constant 0 : index
    %c0_38 = arith.constant 0 : index
    %c0_39 = arith.constant 0 : index
    %115 = vector.load %arg9[%c0_37, %c0_38, %c0_39] : memref<1x1x32xf32, #tpu.memory_space<vmem>>, vector<1x1x32xf32>
    %116 = vector.shape_cast %115 : vector<1x1x32xf32> to vector<1x32xf32>
    %117 = vector.broadcast %116 : vector<1x32xf32> to vector<8x32xf32>
    %118 = arith.addf %114, %117 : vector<8x32xf32>
    %119 = arith.addf %118, %4 : vector<8x32xf32>
    %c0_40 = arith.constant 0 : index
    %c0_41 = arith.constant 0 : index
    %c0_42 = arith.constant 0 : index
    %120 = vector.load %arg10[%c0_40, %c0_41, %c0_42] : memref<1x1x32xf32, #tpu.memory_space<vmem>>, vector<1x1x32xf32>
    %121 = vector.shape_cast %120 : vector<1x1x32xf32> to vector<1x32xf32>
    %c0_43 = arith.constant 0 : index
    %c0_44 = arith.constant 0 : index
    %c0_45 = arith.constant 0 : index
    %122 = vector.load %arg11[%c0_43, %c0_44, %c0_45] : memref<1x1x32xf32, #tpu.memory_space<vmem>>, vector<1x1x32xf32>
    %123 = vector.shape_cast %122 : vector<1x1x32xf32> to vector<1x32xf32>
    %cst_46 = arith.constant dense<0.000000e+00> : vector<8xf32>
    %124 = vector.multi_reduction <add>, %119, %cst_46 [1] : vector<8x32xf32> to vector<8xf32>
    %125 = vector.shape_cast %124 : vector<8xf32> to vector<8x1xf32>
    %cst_47 = arith.constant 3.200000e+01 : f32
    %126 = vector.broadcast %cst_47 : f32 to vector<8x1xf32>
    %127 = arith.divf %125, %126 : vector<8x1xf32>
    %128 = vector.broadcast %127 : vector<8x1xf32> to vector<8x32xf32>
    %129 = arith.subf %119, %128 : vector<8x32xf32>
    %130 = vector.broadcast %127 : vector<8x1xf32> to vector<8x32xf32>
    %131 = arith.subf %119, %130 : vector<8x32xf32>
    %132 = arith.mulf %129, %131 : vector<8x32xf32>
    %cst_48 = arith.constant dense<0.000000e+00> : vector<8xf32>
    %133 = vector.multi_reduction <add>, %132, %cst_48 [1] : vector<8x32xf32> to vector<8xf32>
    %134 = vector.shape_cast %133 : vector<8xf32> to vector<8x1xf32>
    %cst_49 = arith.constant 3.200000e+01 : f32
    %135 = vector.broadcast %cst_49 : f32 to vector<8x1xf32>
    %136 = arith.divf %134, %135 : vector<8x1xf32>
    %137 = vector.broadcast %127 : vector<8x1xf32> to vector<8x32xf32>
    %138 = arith.subf %119, %137 : vector<8x32xf32>
    %cst_50 = arith.constant 9.99999996E-13 : f32
    %139 = vector.broadcast %cst_50 : f32 to vector<8x1xf32>
    %140 = arith.addf %136, %139 : vector<8x1xf32>
    %141 = math.rsqrt %140 : vector<8x1xf32>
    %142 = vector.broadcast %141 : vector<8x1xf32> to vector<8x32xf32>
    %143 = arith.mulf %138, %142 : vector<8x32xf32>
    %144 = vector.broadcast %121 : vector<1x32xf32> to vector<8x32xf32>
    %145 = arith.mulf %143, %144 : vector<8x32xf32>
    %146 = vector.broadcast %123 : vector<1x32xf32> to vector<8x32xf32>
    %147 = arith.addf %145, %146 : vector<8x32xf32>
    %148 = arith.truncf %147 : vector<8x32xf32> to vector<8x32xbf16>
    %c0_51 = arith.constant 0 : index
    %c0_52 = arith.constant 0 : index
    %c0_53 = arith.constant 0 : index
    %149 = vector.load %arg12[%c0_51, %c0_52, %c0_53] : memref<1x32x128xbf16, #tpu.memory_space<vmem>>, vector<1x32x128xbf16>
    %150 = vector.shape_cast %149 : vector<1x32x128xbf16> to vector<32x128xbf16>
    %cst_54 = arith.constant dense<0.000000e+00> : vector<8x128xf32>
    %151 = tpu.matmul %148, %150, %cst_54 {dimension_numbers = #tpu.dot_dimension_numbers<[1], [0], [0], [1], [0, 0, 1, 1], [], []>} : vector<8x32xbf16>, vector<32x128xbf16>, vector<8x128xf32> -> vector<8x128xf32>
    %c0_55 = arith.constant 0 : index
    %c0_56 = arith.constant 0 : index
    %c0_57 = arith.constant 0 : index
    %152 = vector.load %arg13[%c0_55, %c0_56, %c0_57] : memref<1x1x128xf32, #tpu.memory_space<vmem>>, vector<1x1x128xf32>
    %153 = vector.shape_cast %152 : vector<1x1x128xf32> to vector<1x128xf32>
    %154 = vector.broadcast %153 : vector<1x128xf32> to vector<8x128xf32>
    %155 = arith.addf %151, %154 : vector<8x128xf32>
    %cst_58 = arith.constant 5.000000e-01 : f32
    %156 = vector.broadcast %cst_58 : f32 to vector<8x128xf32>
    %157 = arith.mulf %156, %155 : vector<8x128xf32>
    %cst_59 = arith.constant 4.471500e-02 : f32
    %158 = vector.broadcast %cst_59 : f32 to vector<8x128xf32>
    %159 = arith.mulf %158, %155 : vector<8x128xf32>
    %160 = arith.mulf %159, %155 : vector<8x128xf32>
    %161 = arith.mulf %160, %155 : vector<8x128xf32>
    %162 = arith.addf %155, %161 : vector<8x128xf32>
    %cst_60 = arith.constant 0.797884583 : f32
    %163 = vector.broadcast %cst_60 : f32 to vector<8x128xf32>
    %164 = arith.mulf %163, %162 : vector<8x128xf32>
    %165 = math.tanh %164 : vector<8x128xf32>
    %cst_61 = arith.constant 1.000000e+00 : f32
    %166 = vector.broadcast %cst_61 : f32 to vector<8x128xf32>
    %167 = arith.addf %166, %165 : vector<8x128xf32>
    %168 = arith.mulf %157, %167 : vector<8x128xf32>
    %169 = arith.truncf %168 : vector<8x128xf32> to vector<8x128xbf16>
    %c0_62 = arith.constant 0 : index
    %c0_63 = arith.constant 0 : index
    %c0_64 = arith.constant 0 : index
    %170 = vector.load %arg14[%c0_62, %c0_63, %c0_64] : memref<1x128x32xbf16, #tpu.memory_space<vmem>>, vector<1x128x32xbf16>
    %171 = vector.shape_cast %170 : vector<1x128x32xbf16> to vector<128x32xbf16>
    %cst_65 = arith.constant dense<0.000000e+00> : vector<8x32xf32>
    %172 = tpu.matmul %169, %171, %cst_65 {dimension_numbers = #tpu.dot_dimension_numbers<[1], [0], [0], [1], [0, 0, 1, 1], [], []>} : vector<8x128xbf16>, vector<128x32xbf16>, vector<8x32xf32> -> vector<8x32xf32>
    %c0_66 = arith.constant 0 : index
    %c0_67 = arith.constant 0 : index
    %c0_68 = arith.constant 0 : index
    %173 = vector.load %arg15[%c0_66, %c0_67, %c0_68] : memref<1x1x32xf32, #tpu.memory_space<vmem>>, vector<1x1x32xf32>
    %174 = vector.shape_cast %173 : vector<1x1x32xf32> to vector<1x32xf32>
    %175 = vector.broadcast %174 : vector<1x32xf32> to vector<8x32xf32>
    %176 = arith.addf %172, %175 : vector<8x32xf32>
    %177 = arith.addf %176, %147 : vector<8x32xf32>
    %c0_69 = arith.constant 0 : index
    %c0_70 = arith.constant 0 : index
    %c0_71 = arith.constant 0 : index
    %178 = vector.load %arg16[%c0_69, %c0_70, %c0_71] : memref<1x1x32xf32, #tpu.memory_space<vmem>>, vector<1x1x32xf32>
    %179 = vector.shape_cast %178 : vector<1x1x32xf32> to vector<1x32xf32>
    %c0_72 = arith.constant 0 : index
    %c0_73 = arith.constant 0 : index
    %c0_74 = arith.constant 0 : index
    %180 = vector.load %arg17[%c0_72, %c0_73, %c0_74] : memref<1x1x32xf32, #tpu.memory_space<vmem>>, vector<1x1x32xf32>
    %181 = vector.shape_cast %180 : vector<1x1x32xf32> to vector<1x32xf32>
    %cst_75 = arith.constant dense<0.000000e+00> : vector<8xf32>
    %182 = vector.multi_reduction <add>, %177, %cst_75 [1] : vector<8x32xf32> to vector<8xf32>
    %183 = vector.shape_cast %182 : vector<8xf32> to vector<8x1xf32>
    %cst_76 = arith.constant 3.200000e+01 : f32
    %184 = vector.broadcast %cst_76 : f32 to vector<8x1xf32>
    %185 = arith.divf %183, %184 : vector<8x1xf32>
    %186 = vector.broadcast %185 : vector<8x1xf32> to vector<8x32xf32>
    %187 = arith.subf %177, %186 : vector<8x32xf32>
    %188 = vector.broadcast %185 : vector<8x1xf32> to vector<8x32xf32>
    %189 = arith.subf %177, %188 : vector<8x32xf32>
    %190 = arith.mulf %187, %189 : vector<8x32xf32>
    %cst_77 = arith.constant dense<0.000000e+00> : vector<8xf32>
    %191 = vector.multi_reduction <add>, %190, %cst_77 [1] : vector<8x32xf32> to vector<8xf32>
    %192 = vector.shape_cast %191 : vector<8xf32> to vector<8x1xf32>
    %cst_78 = arith.constant 3.200000e+01 : f32
    %193 = vector.broadcast %cst_78 : f32 to vector<8x1xf32>
    %194 = arith.divf %192, %193 : vector<8x1xf32>
    %195 = vector.broadcast %185 : vector<8x1xf32> to vector<8x32xf32>
    %196 = arith.subf %177, %195 : vector<8x32xf32>
    %cst_79 = arith.constant 9.99999996E-13 : f32
    %197 = vector.broadcast %cst_79 : f32 to vector<8x1xf32>
    %198 = arith.addf %194, %197 : vector<8x1xf32>
    %199 = math.rsqrt %198 : vector<8x1xf32>
    %200 = vector.broadcast %199 : vector<8x1xf32> to vector<8x32xf32>
    %201 = arith.mulf %196, %200 : vector<8x32xf32>
    %202 = vector.broadcast %179 : vector<1x32xf32> to vector<8x32xf32>
    %203 = arith.mulf %201, %202 : vector<8x32xf32>
    %204 = vector.broadcast %181 : vector<1x32xf32> to vector<8x32xf32>
    %205 = arith.addf %203, %204 : vector<8x32xf32>
    %206 = arith.truncf %205 : vector<8x32xf32> to vector<8x32xbf16>
    %c0_80 = arith.constant 0 : index
    %c0_81 = arith.constant 0 : index
    %207 = vector.load %arg19[%c0_80, %c0_81] : memref<8x32xbf16, #tpu.memory_space<vmem>>, vector<8x32xbf16>
    tpu.vector_store %arg19[%c0_80, %c0_81], %206 {strides = array<i32>} : memref<8x32xbf16, #tpu.memory_space<vmem>>, vector<8x32xbf16>,
    %c1_i32 = arith.constant 1 : i32
    %208 = arith.cmpi eq, %arg1, %c1_i32 : i32
    %209 = arith.extui %208 : i1 to i32
    %c0_i32_82 = arith.constant 0 : i32
    %210 = arith.cmpi ne, %209, %c0_i32_82 : i32
    scf.if %210 {
      %211 = vector.extract_strided_slice %205 {offsets = [0, 0], sizes = [1, 32], strides = [1, 1]} : vector<8x32xf32> to vector<1x32xf32>
      %212 = arith.truncf %211 : vector<1x32xf32> to vector<1x32xbf16>
      %c0_83 = arith.constant 0 : index
      %c0_84 = arith.constant 0 : index
      %c0_85 = arith.constant 0 : index
      %213 = vector.load %arg18[%c0_83, %c0_84, %c0_85] : memref<1x1x32xbf16, #tpu.memory_space<vmem>>, vector<1x1x32xbf16>
      %214 = vector.shape_cast %213 : vector<1x1x32xbf16> to vector<1x32xbf16>
      %215 = vector.shape_cast %212 : vector<1x32xbf16> to vector<1x1x32xbf16>
      tpu.vector_store %arg18[%c0_83, %c0_84, %c0_85], %215 {strides = array<i32>} : memref<1x1x32xbf16, #tpu.memory_space<vmem>>, vector<1x1x32xbf16>,
    } else {
    }
    return
  }
  func.func @transform_0(%arg0: i32, %arg1: i32) -> (i32, i32, i32) {
    %c0_i32 = arith.constant 0 : i32
    %c0_i32_0 = arith.constant 0 : i32
    %c0_i32_1 = arith.constant 0 : i32
    return %arg0, %c0_i32, %c0_i32_0 : i32, i32, i32
  }
  func.func @transform_1(%arg0: i32, %arg1: i32) -> (i32, i32, i32) {
    %c0_i32 = arith.constant 0 : i32
    %c0_i32_0 = arith.constant 0 : i32
    %c0_i32_1 = arith.constant 0 : i32
    return %arg0, %c0_i32, %c0_i32_0 : i32, i32, i32
  }
  func.func @transform_2(%arg0: i32, %arg1: i32) -> (i32, i32) {
    %c0_i32 = arith.constant 0 : i32
    %c0_i32_0 = arith.constant 0 : i32
    %c0_i32_1 = arith.constant 0 : i32
    return %c0_i32, %c0_i32_0 : i32, i32
  }
  func.func @transform_3(%arg0: i32, %arg1: i32) -> (i32, i32) {
    %c0_i32 = arith.constant 0 : i32
    %c0_i32_0 = arith.constant 0 : i32
    %c0_i32_1 = arith.constant 0 : i32
    return %c0_i32, %c0_i32_0 : i32, i32
  }
  func.func @transform_4(%arg0: i32, %arg1: i32) -> (i32, i32, i32) {
    %c0_i32 = arith.constant 0 : i32
    %c0_i32_0 = arith.constant 0 : i32
    %c0_i32_1 = arith.constant 0 : i32
    return %arg1, %c0_i32, %c0_i32_0 : i32, i32, i32
  }
  func.func @transform_5(%arg0: i32, %arg1: i32) -> (i32, i32, i32) {
    %c0_i32 = arith.constant 0 : i32
    %c0_i32_0 = arith.constant 0 : i32
    %c0_i32_1 = arith.constant 0 : i32
    return %arg1, %c0_i32, %c0_i32_0 : i32, i32, i32
  }
  func.func @transform_6(%arg0: i32, %arg1: i32) -> (i32, i32, i32) {
    %c0_i32 = arith.constant 0 : i32
    %c0_i32_0 = arith.constant 0 : i32
    %c0_i32_1 = arith.constant 0 : i32
    return %arg1, %c0_i32, %c0_i32_0 : i32, i32, i32
  }
  func.func @transform_7(%arg0: i32, %arg1: i32) -> (i32, i32, i32) {
    %c0_i32 = arith.constant 0 : i32
    %c0_i32_0 = arith.constant 0 : i32
    %c0_i32_1 = arith.constant 0 : i32
    return %arg1, %c0_i32, %c0_i32_0 : i32, i32, i32
  }
  func.func @transform_8(%arg0: i32, %arg1: i32) -> (i32, i32, i32) {
    %c0_i32 = arith.constant 0 : i32
    %c0_i32_0 = arith.constant 0 : i32
    %c0_i32_1 = arith.constant 0 : i32
    return %arg1, %c0_i32, %c0_i32_0 : i32, i32, i32
  }
  func.func @transform_9(%arg0: i32, %arg1: i32) -> (i32, i32, i32) {
    %c0_i32 = arith.constant 0 : i32
    %c0_i32_0 = arith.constant 0 : i32
    %c0_i32_1 = arith.constant 0 : i32
    return %arg1, %c0_i32, %c0_i32_0 : i32, i32, i32
  }
  func.func @transform_10(%arg0: i32, %arg1: i32) -> (i32, i32, i32) {
    %c0_i32 = arith.constant 0 : i32
    %c0_i32_0 = arith.constant 0 : i32
    %c0_i32_1 = arith.constant 0 : i32
    return %arg1, %c0_i32, %c0_i32_0 : i32, i32, i32
  }
  func.func @transform_11(%arg0: i32, %arg1: i32) -> (i32, i32, i32) {
    %c0_i32 = arith.constant 0 : i32
    %c0_i32_0 = arith.constant 0 : i32
    %c0_i32_1 = arith.constant 0 : i32
    return %arg1, %c0_i32, %c0_i32_0 : i32, i32, i32
  }
  func.func @transform_12(%arg0: i32, %arg1: i32) -> (i32, i32, i32) {
    %c0_i32 = arith.constant 0 : i32
    %c0_i32_0 = arith.constant 0 : i32
    %c0_i32_1 = arith.constant 0 : i32
    return %arg1, %c0_i32, %c0_i32_0 : i32, i32, i32
  }
  func.func @transform_13(%arg0: i32, %arg1: i32) -> (i32, i32, i32) {
    %c0_i32 = arith.constant 0 : i32
    %c0_i32_0 = arith.constant 0 : i32
    %c0_i32_1 = arith.constant 0 : i32
    return %arg1, %c0_i32, %c0_i32_0 : i32, i32, i32
  }
  func.func @transform_14(%arg0: i32, %arg1: i32) -> (i32, i32, i32) {
    %c0_i32 = arith.constant 0 : i32
    %c0_i32_0 = arith.constant 0 : i32
    %c0_i32_1 = arith.constant 0 : i32
    return %arg1, %c0_i32, %c0_i32_0 : i32, i32, i32
  }
  func.func @transform_15(%arg0: i32, %arg1: i32) -> (i32, i32, i32) {
    %c0_i32 = arith.constant 0 : i32
    %c0_i32_0 = arith.constant 0 : i32
    %c0_i32_1 = arith.constant 0 : i32
    return %arg1, %c0_i32, %c0_i32_0 : i32, i32, i32
  }
  func.func @transform_16(%arg0: i32, %arg1: i32) -> (i32, i32, i32) {
    %c0_i32 = arith.constant 0 : i32
    %c0_i32_0 = arith.constant 0 : i32
    %c0_i32_1 = arith.constant 0 : i32
    return %arg0, %c0_i32, %c0_i32_0 : i32, i32, i32
  }
}

module attributes {stable_mosaic.version = 11 : i64} {
  func.func @_head_kernel(%arg0: memref<2x32xbf16, #tpu.memory_space<vmem>>, %arg1: memref<32x32xbf16, #tpu.memory_space<vmem>>, %arg2: memref<1x32xf32, #tpu.memory_space<vmem>>, %arg3: memref<32x4xbf16, #tpu.memory_space<vmem>>, %arg4: memref<1x4xf32, #tpu.memory_space<vmem>>, %arg5: memref<2x4xf32, #tpu.memory_space<vmem>>) attributes {dimension_semantics = [], scalar_prefetch = 0 : i64, scratch_operands = 0 : i64, tpu.core_type = #tpu.core_type<tc>} {
    %c0 = arith.constant 0 : index
    %c0_0 = arith.constant 0 : index
    %0 = vector.load %arg0[%c0, %c0_0] : memref<2x32xbf16, #tpu.memory_space<vmem>>, vector<2x32xbf16>
    %c0_1 = arith.constant 0 : index
    %c0_2 = arith.constant 0 : index
    %1 = vector.load %arg1[%c0_1, %c0_2] : memref<32x32xbf16, #tpu.memory_space<vmem>>, vector<32x32xbf16>
    %cst = arith.constant dense<0.000000e+00> : vector<2x32xf32>
    %2 = tpu.matmul %0, %1, %cst {dimension_numbers = #tpu.dot_dimension_numbers<[1], [0], [0], [1], [0, 0, 1, 1], [], []>} : vector<2x32xbf16>, vector<32x32xbf16>, vector<2x32xf32> -> vector<2x32xf32>
    %c0_3 = arith.constant 0 : index
    %c0_4 = arith.constant 0 : index
    %3 = vector.load %arg2[%c0_3, %c0_4] : memref<1x32xf32, #tpu.memory_space<vmem>>, vector<1x32xf32>
    %4 = vector.broadcast %3 : vector<1x32xf32> to vector<2x32xf32>
    %5 = arith.addf %2, %4 : vector<2x32xf32>
    %6 = math.tanh %5 : vector<2x32xf32>
    %7 = arith.truncf %6 : vector<2x32xf32> to vector<2x32xbf16>
    %c0_5 = arith.constant 0 : index
    %c0_6 = arith.constant 0 : index
    %8 = vector.load %arg3[%c0_5, %c0_6] : memref<32x4xbf16, #tpu.memory_space<vmem>>, vector<32x4xbf16>
    %cst_7 = arith.constant dense<0.000000e+00> : vector<2x4xf32>
    %9 = tpu.matmul %7, %8, %cst_7 {dimension_numbers = #tpu.dot_dimension_numbers<[1], [0], [0], [1], [0, 0, 1, 1], [], []>} : vector<2x32xbf16>, vector<32x4xbf16>, vector<2x4xf32> -> vector<2x4xf32>
    %c0_8 = arith.constant 0 : index
    %c0_9 = arith.constant 0 : index
    %10 = vector.load %arg4[%c0_8, %c0_9] : memref<1x4xf32, #tpu.memory_space<vmem>>, vector<1x4xf32>
    %11 = vector.broadcast %10 : vector<1x4xf32> to vector<2x4xf32>
    %12 = arith.addf %9, %11 : vector<2x4xf32>
    %cst_10 = arith.constant dense<0xFF800000> : vector<2xf32>
    %13 = vector.multi_reduction <maximumf>, %12, %cst_10 [1] : vector<2x4xf32> to vector<2xf32>
    %14 = vector.shape_cast %13 : vector<2xf32> to vector<2x1xf32>
    %15 = vector.broadcast %14 : vector<2x1xf32> to vector<2x4xf32>
    %16 = arith.subf %12, %15 : vector<2x4xf32>
    %17 = math.exp %16 : vector<2x4xf32>
    %cst_11 = arith.constant dense<0.000000e+00> : vector<2xf32>
    %18 = vector.multi_reduction <add>, %17, %cst_11 [1] : vector<2x4xf32> to vector<2xf32>
    %19 = vector.shape_cast %18 : vector<2xf32> to vector<2x1xf32>
    %20 = vector.broadcast %19 : vector<2x1xf32> to vector<2x4xf32>
    %21 = arith.divf %17, %20 : vector<2x4xf32>
    %c0_12 = arith.constant 0 : index
    %c0_13 = arith.constant 0 : index
    %22 = vector.load %arg5[%c0_12, %c0_13] : memref<2x4xf32, #tpu.memory_space<vmem>>, vector<2x4xf32>
    tpu.vector_store %arg5[%c0_12, %c0_13], %21 {strides = array<i32>} : memref<2x4xf32, #tpu.memory_space<vmem>>, vector<2x4xf32>,
    return
  }
}

</mosaic_0001>

<bundles_post_ra>
// kernel: bert_classifier_forward.3
= control target key start
LH: loop header
LB: loop body
LE: loop exit
PB: predicated region body
PF: predicated region fallthrough
CT: control target
= control target key end

     0   :  { %v252_v1 = vmov 0.0   ;;  %vm253_vm0 = vmmov 0   ;;  %s323_s0 = inlined_call_operand.vmem [shape: bf16[2,32], index: 0, kind: input, shape index: {}]   ;;  %s324_s1 = inlined_call_operand.vmem [shape: bf16[32,32], index: 1, kind: input, shape index: {}]   ;;  %s325_s2 = inlined_call_operand.vmem [shape: f32[1,32], index: 2, kind: input, shape index: {}]   ;;  %s326_s3 = inlined_call_operand.vmem [shape: bf16[32,4], index: 3, kind: input, shape index: {}]   ;;  %s327_s4 = inlined_call_operand.vmem [shape: f32[1,4], index: 4, kind: input, shape index: {}]   ;;  %s328_s5 = inlined_call_operand.hbm [shape: f32[2,4], index: 5, kind: output, shape index: {}]  }
   0x1   :  { %v218_v0 = vld [vmem:[%s324_s1] sm:$0xff]   ;;  %199 = vmatprep.subr.bf16.mxu0 %v252_v1  ;;  %207 = vmatprep.subr.bf16.mxu1 %v252_v1  ;;  %v219_v2 = vld [vmem:[%s324_s1 + $0x8] sm:$0xff]  }
   0x2   :  { %200 = vmatpush3.bf16.msra.mxu0 %v218_v0  ;;  %203 = vmatprep.mubr.msk.bf16.mxu0 %vm253_vm0, %v252_v1 }
   0x3   :  { %201 = vmatprep.subr.bf16.mxu0 %v252_v1  ;;  %211 = vmatprep.mubr.msk.bf16.mxu1 %vm253_vm0, %v252_v1 }
   0x4   :  { %10 = vsyncpa [#allocation3], 0  ;;  %v22_v3 = vld [vmem:[%s323_s0] sm:$0x1]  ;;  %vm46_vm1 = vcmask 261120   ;;  %v221_v5 = vld [vmem:[%s326_s3 + $0x8] sm:$0xff]  }
   0x5   :  { %v220_v4 = vld [vmem:[%s326_s3] sm:$0xff]   ;;  %vm158_vm2 = vcmask 25600  }
   0x6   :  { %202 = vmatpush3.bf16.msra.mxu0 %v219_v2  ;;  %208 = vmatpush3.bf16.msra.mxu1 %v220_v4  ;;  %v185_v6 = vld [vmem:[%s325_s2] ss:$0 sm:$0xff]  ;;  %s254_s2 = smov [#allocation2]  }
   0x7   :  { %209 = vmatprep.subr.bf16.mxu1 %v252_v1  ;;  %v189_v14 = vld [vmem:[%s327_s4] ss:$0 sm:$0xff]  ;;  %s177_s3 = sshll.u32 %s254_s2, 4  ;;  %s178_s3 = int_to_ptr.vmem [resolvable:$true] %s177_s3 }
   0x8   :  { %s228_s4 = scalar_lea.vmem %s178_s3, 32  ;;  %p233_p1 = scmp.lt.s32.totalorder %s178_s3, %s178_s3 }
   0x9   :  { %204 = vmatmul.mubr.msk.bf16.vlgmr.msra.gmra.mrb[0].mxu0 %vm46_vm1, %v22_v3  ;;  %p229_p0 = scmp.ne.s32.totalorder %s178_s3, %s228_s4  ;;  %p234_p2 = scmp.lt.s32.totalorder %s228_s4, %s228_s4 }
   0xa   :  { %210 = vmatpush3.bf16.msra.mxu1 %v221_v5 }
   0xb   :  { %p235_p3 = por %p234_p2, %p233_p1 }
   0xd   :  { %p236_p4 = pnand %p235_p3, %p229_p0 }
  0xdc   :  { %v84_v7 = vpop.f32.mrb[0].mxu0 }
  0xdd   :  { %v85_v8 = vadd.f32 %v185_v6, %v84_v7  ;;  %v205_v9 = vpop.f32.mrb[1].mxu0 }
  0xde   :  { %v87_v10 = vpop.f32.mrb[2].mxu0 }
  0xdf   :  { %222 = vtanh.f32 %v85_v8  ;;  %v206_v11 = vpop.f32.mrb[3].mxu0 }
  0xe9   :  { %v223_v12 = vpop.eup %222 }
  0xea   :  { %v91_v13 = vpack.c.bf16 %v223_v12, %v223_v12 }
  0xec   :  { %212 = vmatmul.mubr.msk.bf16.vlgmr.msra.gmra.mrb[0].mxu1 %vm46_vm1, %v91_v13 }
 0x1bf   :  { %v152_v15 = vpop.f32.mrb[0].mxu1 }
 0x1c0   :  { %v153_v16 = vadd.f32 %v189_v14, %v152_v15  ;;  %v213_v17 = vpop.f32.mrb[1].mxu1 }
 0x1c1   :  { %v155_v18 = vpop.f32.mrb[2].mxu1 }
 0x1c2   :  { %v214_v19 = vpop.f32.mrb[3].mxu1  ;;  %v159_v20 = vsel %vm158_vm2, %v153_v16, -inf }
 0x1c3   :  { %160 = vmax.xlane.f32.xlu0 %v159_v20 }
 0x250   :  { %v161_v21 = vpop.xlane.xlu0 %160 }
 0x251   :  { %v162_v22 = vsub.f32 %v153_v16, %v161_v21 }
 0x253   :  { %v163_v23 = vmul.f32 1.442695, %v162_v22 }
 0x255   :  { %224 = vpow2.f32 %v163_v23 }
 0x25f   :  { %v225_v24 = vpop.eup %224 }
 0x260   :  { %v165_v25 = vsel %vm158_vm2, %v225_v24, 0.0 }
 0x261   :  { %166 = vadd.xlane.f32.xlu0 %v165_v25 }
 0x2ee   :  { %v167_v26 = vpop.xlane.xlu0 %166 }
 0x2ef   :  { %226 = vrcp.f32 %v167_v26 }
 0x2f9   :  { %v227_v27 = vpop.eup %226 }
 0x2fa   :  { %v169_v28 = vmul.f32 %v227_v27, %v225_v24 }
 0x2fc   :  { %170 = vst.msk [vmem:[#allocation2] sm:$0x3] %vm158_vm2, %v169_v28 }
 0x2fd   :  { %239 = shalt.err (!%p236_p4)
}
 0x2fe   :  { %s240_s7 = scalar_lea.hbm %s328_s5, 32 }
 0x2ff   :  { %p241_p5 = scmp.ne.s32.totalorder %s328_s5, %s240_s7  ;;  %p244_p6 = scmp.lt.u32.totalorder %s240_s7, %s328_s5 }
 0x301   :  { %p246_p7 = pnand %p244_p6, %p241_p5 }
 0x303   :  { %249 = shalt.err (!%p246_p7)
}
 0x304   :  { %180 = dma.vmem_to_hbm [thread:$0]  %s178_s3, 32, %s328_s5, [#allocation3]  }
 0x305   :  { %250 = dma.done.wait [#allocation3], 32  }
 0x306   :  { %251 = vsyncadd [#allocation3], 4294967264 }
 0x307   :  { %184 = vsyncpa [#allocation3], 1 }

// kernel: bert_classifier_forward.2
= control target key start
LH: loop header
LB: loop body
LE: loop exit
PB: predicated region body
PF: predicated region fallthrough
CT: control target
= control target key end

     0   :  { %s2252_s21 = smov 0   ;;  %s2254_s22 = smov 0   ;;  %s2538_s0 = inlined_call_operand.vmem [shape: f32[2,8,32], index: 0, kind: input, shape index: {}]   ;;  %s2539_s1 = inlined_call_operand.vmem [shape: f32[2,1,8], index: 1, kind: input, shape index: {}]   ;;  %s2540_s2 = inlined_call_operand.vmem [shape: f32[1,32], index: 2, kind: input, shape index: {}]   ;;  %s2541_s3 = inlined_call_operand.vmem [shape: f32[1,32], index: 3, kind: input, shape index: {}]   ;;  %s2542_s4 = inlined_call_operand.vmem [shape: bf16[2,32,96], index: 4, kind: input, shape index: {}]   ;;  %s2543_s5 = inlined_call_operand.vmem [shape: f32[2,1,96], index: 5, kind: input, shape index: {}]   ;;  %s2544_s6 = inlined_call_operand.vmem [shape: bf16[2,32,32], index: 6, kind: input, shape index: {}]   ;;  %s2545_s7 = inlined_call_operand.vmem [shape: f32[2,1,32], index: 7, kind: input, shape index: {}]   ;;  %s2546_s8 = inlined_call_operand.vmem [shape: f32[2,1,32], index: 8, kind: input, shape index: {}]   ;;  %s2547_s9 = inlined_call_operand.vmem [shape: f32[2,1,32], index: 9, kind: input, shape index: {}]   ;;  %s2548_s10 = inlined_call_operand.vmem [shape: bf16[2,32,128], index: 10, kind: input, shape index: {}]   ;;  %s2549_s11 = inlined_call_operand.vmem [shape: f32[2,1,128], index: 11, kind: input, shape index: {}]   ;;  %s2550_s12 = inlined_call_operand.vmem [shape: bf16[2,128,32], index: 12, kind: input, shape index: {}]   ;;  %s2551_s13 = inlined_call_operand.vmem [shape: f32[2,1,32], index: 13, kind: input, shape index: {}]   ;;  %s2552_s14 = inlined_call_operand.vmem [shape: f32[2,1,32], index: 14, kind: input, shape index: {}]   ;;  %s2553_s15 = inlined_call_operand.vmem [shape: f32[2,1,32], index: 15, kind: input, shape index: {}]   ;;  %s2554_s16 = inlined_call_operand.vmem [shape: bf16[2,1,32], index: 16, kind: output, shape index: {}]  }
   0x1   :  { %2559 = sst [smem:[#allocation9_spill]] %s2538_s0  ;;  %s2256_s23 = smov 0  }
   0x2   :  { %2560 = sst [smem:[#allocation10_spill]] %s2539_s1  ;;  %s2258_s24 = smov 0  }
   0x3   :  { %2561 = sst [smem:[#allocation11_spill]] %s2540_s2  ;;  %s2260_s25 = smov 0  }
   0x4   :  { %2562 = sst [smem:[#allocation12_spill]] %s2541_s3 }
   0x5   :  { %2563 = sst [smem:[#allocation13_spill]] %s2542_s4 }
   0x6   :  { %2564 = sst [smem:[#allocation14_spill]] %s2544_s6 }
   0x7   :  { %2565 = sst [smem:[#allocation15_spill]] %s2548_s10 }
   0x8   :  { %2566 = sst [smem:[#allocation16_spill]] %s2549_s11 }
   0x9   :  { %2567 = sst [smem:[#allocation17_spill]] %s2553_s15 }
   0xa   :  { %2568 = sst [smem:[#allocation18_spill]] %s2554_s16 }
   0xb LB: > { %2569 = sst [smem:[#allocation3_spill]] %s2133_s21  ;;  %s35_s26 = sadd.s32 1, %s2141_s23  ;;  %s2149_s25 = sphi %s2260_s25, %s26_s25   ;;  %s2145_s24 = sphi %s2258_s24, %s2600_s24   ;;  %s2141_s23 = sphi %s2256_s23, %s2599_s23   ;;  %s2137_s22 = sphi %s2254_s22, %s2598_s22   ;;  %s2133_s21 = sphi %s2252_s21, %s2597_s21  }
   0xc   : > { %2570 = sst [smem:[#allocation4_spill]] %s2141_s23  ;;  %s38_s27 = sadd.s32 1, %s2145_s24 }
   0xd   : > { %2571 = sst [smem:[#allocation5_spill]] %s2145_s24  ;;  %p36_p0 = scmp.ge.s32.totalorder %s35_s26, 2 }
   0xe   : > { %2572 = sst [smem:[#allocation6_spill]] %s2149_s25  ;;  %p1838_p1 = scmp.ge.s32.totalorder %s2149_s25, 1 }
   0xf   : > { %p585_p2 = scmp.lt.s32.totalorder %s2149_s25, 5  ;;  %s2602_s26 = smov (%p36_p0, %s35_s26), 0 }
  0x10   : > { %2573 = sst [smem:[#allocation7_spill]] %s2602_s26  ;;  %s2604_s27 = smov (!%p36_p0, %s38_s27), %s2145_s24 }
  0x11   : > { %p586_p3 = pnand %p1838_p1, %p585_p2  ;;  %p40_p4 = scmp.ge.s32.totalorder %s2604_s27, 2 }
  0x12   : > { %p679_p5 = scmp.lt.s32.totalorder (!%p586_p3), %s2137_s22, 1  ;;  %p686_p6 = scmp.lt.s32.totalorder (!%p586_p3), %s2133_s21, 1 }
  0x13   : > { %s2606_s27 = smov (%p40_p4, %s2604_s27), 0  ;;  %589 = sbr.rel (%p586_p3) target bundleno = 2925 (0xb6d), region = 84 }
  0x14   : > { %2574 = sst [smem:[#allocation8_spill]] %s2606_s27  ;;  %s2576_s20 = sld [smem:[#allocation9_spill]] (!%p586_p3) }
  0x15   : > { %s2577_s4 = sld [smem:[#allocation13_spill]] (!%p586_p3)  ;;  %s2578_s6 = sld [smem:[#allocation14_spill]] (!%p586_p3) }
  0x16   : > { %s2579_s10 = sld [smem:[#allocation15_spill]] (!%p586_p3)  ;;  %s2583_s17 = sld [smem:[#allocation3_spill]] (!%p586_p3) }
  0x1a   : > { %s2608_s22 = smov (!%p679_p5, %s2137_s22), 1 }
  0x1b   : > { %s2288_s28 = scalar_select %p686_p6, %s2133_s21, 1 }
  0x1c   : > { %s1839_s29 = sshll.u32 %s2608_s22, 3  ;;  %s2582_s21 = sld [smem:[#allocation18_spill]] }
  0x1d   : > { %s682_s27 = scalar_lea.vmem %s2576_s20, %s1839_s29  ;;  %s1887_s26 = sshll.u32 %s2288_s28, 4 }
  0x1e   : > { %s2302_s25 = scalar_lea.vmem %s2577_s4, %s1887_s26  ;;  %s2311_s30 = scalar_lea.vmem %s2578_s6, %s1887_s26 }
  0x1f   : > { %s2328_s3 = scalar_lea.vmem %s2579_s10, %s1887_s26  ;;  %s1890_s6 = sshll.u32 %s2288_s28, 6 }
  0x20   : > { %s723_s18 = scalar_lea.vmem %s2551_s13, %s2288_s28  ;;  %s2342_s20 = scalar_lea.vmem %s2550_s12, %s1890_s6 }
  0x21   : > { %s726_s1 = scalar_lea.vmem %s2552_s14, %s2288_s28  ;;  %s2581_s4 = sld [smem:[#allocation17_spill]] }
  0x22   : > { %s2356_s11 = scalar_lea.vmem %s2582_s21, %s2608_s22  ;;  %p1848_p7 = scmp.ne.s32.totalorder %s2583_s17, 0 }
  0x23   : > { %v738_v0 = vld [vmem:[%s682_s27] sm:$0xff] (!%p1848_p7)  ;;  %vm741_vm0 = vcmask (!%p1848_p7), 261120   ;;  %s2584_s21 = sld [smem:[#allocation11_spill]] (!%p1848_p7)  ;;  %s2585_s29 = sld [smem:[#allocation12_spill]] (!%p1848_p7)  ;;  %vm771_vm1 = vcmask (!%p1848_p7), 257024  }
  0x24   : > { %737 = sbr.rel (%p1848_p7) target bundleno = 352 (0x160), region = 88  ;;  %v742_v1 = vsel (!%p1848_p7), %vm741_vm0, %v738_v0, 0.0 }
  0x25   : > { %743 = vadd.xlane.f32.xlu0 (!%p1848_p7), %v742_v1 }
  0x27   : > { %s729_s10 = scalar_lea.vmem %s2581_s4, %s2288_s28 }
  0x29   : > { %v1849_v11 = vld [vmem:[%s2584_s21] ss:$0 sm:$0xff] (!%p1848_p7) }
  0x2a   : > { %v1850_v13 = vld [vmem:[%s2585_s29] ss:$0 sm:$0xff] (!%p1848_p7) }
  0xb2   : > { %v744_v2 = vpop.xlane.xlu0 %743 }
  0xb3   : > { %v746_v3 = vmul.f32 0.03125, %v744_v2 }
  0xb5   : > { %v747_v4 = vsub.f32 %v738_v0, %v746_v3 }
  0xb7   : > { %v748_v5 = vmul.f32 %v747_v4, %v747_v4 }
  0xb9   : > { %v749_v6 = vsel %vm741_vm0, %v748_v5, 0.0 }
  0xba   : > { %750 = vadd.xlane.f32.xlu0 %v749_v6 }
 0x147   : > { %v751_v7 = vpop.xlane.xlu0 %750 }
 0x148   : > { %v752_v8 = vmul.f32 0.03125, %v751_v7 }
 0x14a   : > { %v753_v9 = vadd.f32 1e-12, %v752_v8 }
 0x14c   : > { %2073 = vrsqrt.f32 %v753_v9 }
 0x156   : > { %v2074_v10 = vpop.eup %2073 }
 0x157   : > { %v755_v12 = vmul.f32 %v2074_v10, %v747_v4 }
 0x159   : > { %v762_v14 = vmul.f32 %v1849_v11, %v755_v12 }
 0x15b   : > { %v769_v15 = vadd.f32 %v1850_v13, %v762_v14 }
 0x15d   : > { %v770_v16 = vpack.c.bf16 %v769_v15, %v769_v15 }
 0x15f   : > { %772 = vst.msk [vmem:[#allocation2] sm:$0xf] %vm771_vm1, %v770_v16 }
 0x160 PF: > { %v2075_v17 = vld [vmem:[%s2302_s25] sm:$0xff]   ;;  %v2151_v18 = vmov 0.0   ;;  %v2076_v19 = vld [vmem:[%s2302_s25 + $0x8] sm:$0xff]   ;;  %vm2152_vm2 = vmmov 0   ;;  %vm798_vm3 = vcmask 261120   ;;  %s2586_s23 = scalar_lea.vmem %s2543_s5, %s2288_s28  ;;  %s2153_s24 = smov 120   ;;  %v898_v39 = vlaneseq }
 0x161   : > { %1925 = vmatprep.subr.bf16.mxu0 %v2151_v18  ;;  %1945 = vmatprep.subr.bf16.mxu1 %v2151_v18  ;;  %v1851_v21 = vld [vmem:[%s2586_s23] ss:$0 sm:$0xff]  ;;  %s2154_s26 = smov 96   ;;  %s2155_s2 = smov 80   ;;  %vm849_vm4 = vcmask 64512   ;;  %vm921_vm5 = vcmask 1043456  }
 0x162   : > { %1926 = vmatpush3.bf16.msra.mxu0 %v2075_v17  ;;  %1929 = vmatprep.mubr.msk.bf16.mxu0 %vm2152_vm2, %v2151_v18  ;;  %s2156_s15 = smov 88   ;;  %s2157_s16 = smov 72   ;;  %v899_v42 = vshrl.u32 %v898_v39, 7  ;;  %vm1314_vm6 = vcmask 130048   ;;  %vm1316_vm7 = vcmask 195584   ;;  %vm1635_vm8 = vcmask 257024  }
 0x163   : > { %1927 = vmatprep.subr.bf16.mxu0 %v2151_v18  ;;  %1947 = vmatprep.mubr.msk.bf16.mxu1 %vm2152_vm2, %v2151_v18  ;;  %s2158_s17 = smov 112   ;;  %s2159_s4 = smov 104  }
 0x164   : > { %s2587_s27 = sld [smem:[#allocation10_spill]]  ;;  %v900_v44 = vsub.s32 0, %v899_v42  ;;  %s2161_s29 = smov 64  }
 0x165   : > { %s2162_s25 = smov 40   ;;  %s2163_s19 = smov 48  }
 0x166   : > { %v2374_v20 = vld [vmem:[#allocation2] sm:$0xf]  ;;  %1928 = vmatpush3.bf16.msra.mxu0 %v2076_v19  ;;  %s2164_s23 = smov 8   ;;  %s2591_s21 = scalar_lea.vmem %s2547_s9, %s2288_s28 }
 0x167   : > { %1933 = vmatprep.subr.bf16.mxu0 %v2151_v18 }
 0x169   : > { %1930 = vmatmul.mubr.msk.bf16.vlgmr.msra.gmra.mrb[0].mxu0 %vm798_vm3, %v2374_v20 }
 0x16a   : > { %1935 = vmatprep.mubr.msk.bf16.mxu0 %vm2152_vm2, %v2151_v18  ;;  %s2588_s0 = scalar_lea.vmem %s2587_s27, %s2608_s22  ;;  %s2160_s22 = smov 56  }
 0x16b   : > { %v842_v40 = vld [vmem:[%s2588_s0] sm:$0x1] }
 0x16c   : > { %v843_v41 = vsub.f32 1.0, %v842_v40 }
 0x16e   : > { %v844_v43 = vmul.f32 -1e+09, %v843_v41 }
 0x170   : > { %v901_v45 = vrot.slane %v844_v43, %v900_v44 }
 0x23c   : > { %v836_v22 = vpop.f32.mrb[0].mxu0 }
 0x23d   : > { %v837_v23 = vadd.f32 %v1851_v21, %v836_v22  ;;  %v1931_v24 = vpop.f32.mrb[1].mxu0 }
 0x23e   : > { %v839_v25 = vpop.f32.mrb[2].mxu0 }
 0x23f   : > { %v2386_v26 = vpack.c.bf16 %v837_v23, %v837_v23  ;;  %v1932_v27 = vpop.f32.mrb[3].mxu0 }
 0x241   : > { %965 = vrot.lane.b32.xlu1 %v2386_v26, %s2153_s24  ;;  %847 = vrot.lane.b32.xlu0 %v2386_v26, %s2154_s26  ;;  %s2165_s24 = smov 16   ;;  %s2166_s26 = smov 24  }
 0x245   : > { %1079 = vrot.lane.b32.xlu1 %v2386_v26, %s2155_s2  ;;  %967 = vrot.lane.b32.xlu0 %v2386_v26, %s2156_s15  ;;  %s2589_s15 = scalar_lea.vmem %s2545_s7, %s2288_s28 }
 0x249   : > { %1191 = vrot.lane.b32.xlu1 %v2386_v26, %s2157_s16  ;;  %1077 = vrot.lane.b32.xlu0 %v2386_v26, %s2158_s17 }
 0x24d   : > { %1189 = vrot.lane.b32.xlu0 %v2386_v26, %s2159_s4  ;;  %s2590_s4 = scalar_lea.vmem %s2546_s8, %s2288_s28 }
 0x2b3   : > { %v848_v28 = vpop.permute.xlu0 %847  ;;  %v966_v30 = vpop.permute.xlu1 %965 }
 0x2b4   : > { %v854_v29 = vsel %vm849_vm4, %v848_v28, 0 }
 0x2b5   : > { %1934 = vmatpush3.bf16.xpose.msra.mxu0 %v854_v29 }
 0x2b6   : > { %1939 = vmatprep.subr.bf16.mxu0 %v2151_v18 }
 0x2b7   : > { %v968_v31 = vpop.permute.xlu0 %967  ;;  %v1080_v33 = vpop.permute.xlu1 %1079 }
 0x2b8   : > { %v973_v32 = vsel %vm849_vm4, %v968_v31, 0  ;;  %v1085_v34 = vsel %vm849_vm4, %v1080_v33, 0 }
 0x2b9   : > { %1946 = vmatpush3.bf16.xpose.msra.mxu1 %v973_v32 }
 0x2ba   : > { %1957 = vmatprep.subr.bf16.mxu1 %v2151_v18 }
 0x2bb   : > { %v1192_v35 = vpop.permute.xlu1 %1191  ;;  %v1078_v36 = vpop.permute.xlu0 %1077 }
 0x2bc   : > { %1936 = vmatmul.mubr.msk.bf16.vlgmr.msra.gmra.mrb[4].mxu0 %vm849_vm4, %v2386_v26  ;;  %v1197_v37 = vsel %vm849_vm4, %v1192_v35, 0 }
 0x2bd   : > { %1941 = vmatprep.mubr.msk.bf16.mxu0 %vm2152_vm2, %v2151_v18 }
 0x2bf   : > { %v1190_v38 = vpop.permute.xlu0 %1189 }
 0x2c0   : > { %1948 = vmatmul.mubr.msk.bf16.vlgmr.msra.gmra.mrb[0].mxu1 %vm849_vm4, %v966_v30 }
 0x2c1   : > { %1958 = vmatpush3.bf16.xpose.msra.mxu1 %v1085_v34  ;;  %1959 = vmatprep.mubr.msk.bf16.mxu1 %vm2152_vm2, %v2151_v18 }
 0x2c2   : > { %1969 = vmatprep.subr.bf16.mxu1 %v2151_v18 }
 0x2c8   : > { %1960 = vmatmul.mubr.msk.bf16.vlgmr.msra.gmra.mrb[4].mxu1 %vm849_vm4, %v1078_v36 }
 0x2c9   : > { %1970 = vmatpush3.bf16.xpose.msra.mxu1 %v1197_v37  ;;  %1971 = vmatprep.mubr.msk.bf16.mxu1 %vm2152_vm2, %v2151_v18 }
 0x2ca   : > { %1981 = vmatprep.subr.bf16.mxu1 %v2151_v18 }
 0x2d0   : > { %1972 = vmatmul.mubr.msk.bf16.vlgmr.msra.gmra.mrb[8].mxu1 %vm849_vm4, %v1190_v38 }
 0x2d1   : > { %1985 = vmatprep.mubr.msk.bf16.mxu1 %vm2152_vm2, %v2151_v18 }
 0x38f   : > { %v890_v46 = vpop.f32.mrb[4].mxu0 }
 0x390   : > { %v896_v47 = vmul.f32 0.35355338, %v890_v46  ;;  %v1937_v48 = vpop.f32.mrb[5].mxu0 }
 0x391   : > { %v893_v49 = vpop.f32.mrb[6].mxu0 }
 0x392   : > { %v1938_v50 = vpop.f32.mrb[7].mxu0  ;;  %v903_v51 = vadd.f32 %v901_v45, %v896_v47 }
 0x393   : > { %v1009_v52 = vpop.f32.mrb[0].mxu1 }
 0x394   : > { %v1015_v53 = vmul.f32 0.35355338, %v1009_v52  ;;  %v1949_v54 = vpop.f32.mrb[1].mxu1  ;;  %v904_v55 = vsel %vm849_vm4, %v903_v51, -inf }
 0x395   : > { %v1012_v56 = vpop.f32.mrb[2].mxu1  ;;  %905 = vmax.xlane.f32.xlu1 %v904_v55 }
 0x396   : > { %v1950_v57 = vpop.f32.mrb[3].mxu1  ;;  %v1016_v58 = vadd.f32 %v1015_v53, %v901_v45 }
 0x398   : > { %v1017_v59 = vsel %vm849_vm4, %v1016_v58, -inf }
 0x399   : > { %1018 = vmax.xlane.f32.xlu0 %v1017_v59 }
 0x39b   : > { %v1121_v60 = vpop.f32.mrb[4].mxu1 }
 0x39c   : > { %v1127_v61 = vmul.f32 0.35355338, %v1121_v60  ;;  %v1961_v62 = vpop.f32.mrb[5].mxu1 }
 0x39d   : > { %v1124_v63 = vpop.f32.mrb[6].mxu1 }
 0x39e   : > { %v1962_v0 = vpop.f32.mrb[7].mxu1  ;;  %v1128_v1 = vadd.f32 %v1127_v61, %v901_v45 }
 0x39f   : > { %v2077_v0 = vld [vmem:[%s2311_s30] sm:$0xff]  }
 0x3a0   : > { %v1129_v2 = vsel %vm849_vm4, %v1128_v1, -inf  ;;  %1982 = vmatpush3.bf16.msra.mxu1 %v2077_v0 }
 0x3a1   : > { %1130 = vmax.xlane.f32.xlu0 %v1129_v2  ;;  %1983 = vmatprep.subr.bf16.mxu1 %v2151_v18 }
 0x3a3   : > { %v1233_v3 = vpop.f32.mrb[8].mxu1 }
 0x3a4   : > { %v1239_v4 = vmul.f32 0.35355338, %v1233_v3  ;;  %v1973_v5 = vpop.f32.mrb[9].mxu1 }
 0x3a5   : > { %v1236_v6 = vpop.f32.mrb[10].mxu1 }
 0x3a6   : > { %v1974_v7 = vpop.f32.mrb[11].mxu1  ;;  %v1240_v8 = vadd.f32 %v1239_v4, %v901_v45 }
 0x3a8   : > { %v1241_v9 = vsel %vm849_vm4, %v1240_v8, -inf }
 0x3a9   : > { %1242 = vmax.xlane.f32.xlu1 %v1241_v9 }
 0x422   : > { %v906_v10 = vpop.xlane.xlu1 %905 }
 0x423   : > { %v907_v11 = vsub.f32 %v903_v51, %v906_v10 }
 0x425   : > { %v908_v12 = vmul.f32 1.442695, %v907_v11 }
 0x426   : > { %v1019_v13 = vpop.xlane.xlu0 %1018 }
 0x427   : > { %2089 = vpow2.f32 %v908_v12  ;;  %v1020_v14 = vsub.f32 %v1016_v58, %v1019_v13 }
 0x429   : > { %v1021_v15 = vmul.f32 1.442695, %v1020_v14 }
 0x42b   : > { %2091 = vpow2.f32 %v1021_v15 }
 0x42e   : > { %v1131_v16 = vpop.xlane.xlu0 %1130 }
 0x42f   : > { %v1132_v17 = vsub.f32 %v1128_v1, %v1131_v16  ;;  %v2078_v1 = vld [vmem:[%s2311_s30 + $0x8] sm:$0xff]   ;;  %s2595_s30 = sld [smem:[#allocation3_spill]] }
 0x430   : > { %1984 = vmatpush3.bf16.msra.mxu1 %v2078_v1 }
 0x431   : > { %v2090_v19 = vpop.eup %2089  ;;  %v1133_v21 = vmul.f32 1.442695, %v1132_v17  ;;  %1997 = vmatprep.subr.bf16.mxu1 %v2151_v18  ;;  %v1863_v17 = vld [vmem:[%s2589_s15] ss:$0 sm:$0xff] }
 0x432   : > { %v910_v22 = vsel %vm849_vm4, %v2090_v19, 0.0 }
 0x433   : > { %2093 = vpow2.f32 %v1133_v21  ;;  %911 = vadd.xlane.f32.xlu0 %v910_v22 }
 0x435   : > { %v2092_v23 = vpop.eup %2091  ;;  %p1884_p8 = scmp.ne.s32.totalorder %s2595_s30, 1 }
 0x436   : > { %v1023_v24 = vsel %vm849_vm4, %v2092_v23, 0.0  ;;  %v1243_v28 = vpop.xlane.xlu1 %1242  ;;  %vm1641_vm9 = vcmask (!%p1884_p8), 253952   ;;  %vm1642_vm10 = vsmask.f32 (!%p1884_p8), 256 }
 0x437   : > { %1024 = vadd.xlane.f32.xlu1 %v1023_v24  ;;  %v1244_v29 = vsub.f32 %v1240_v8, %v1243_v28  ;;  %vm1643_vm11 = vmand (!%p1884_p8), %vm1641_vm9, %vm1642_vm10 }
 0x439   : > { %v1245_v30 = vmul.f32 1.442695, %v1244_v29 }
 0x43b   : > { %2095 = vpow2.f32 %v1245_v30 }
 0x43d   : > { %v2094_v25 = vpop.eup %2093 }
 0x43e   : > { %v1135_v27 = vsel %vm849_vm4, %v2094_v25, 0.0 }
 0x43f   : > { %1136 = vadd.xlane.f32.xlu0 %v1135_v27 }
 0x445   : > { %v2096_v31 = vpop.eup %2095 }
 0x446   : > { %v1247_v32 = vsel %vm849_vm4, %v2096_v31, 0.0 }
 0x448   : > { %1029 = vrot.lane.b32.xlu1 %v2386_v26, %s2160_s22  ;;  %s2592_s22 = sld [smem:[#allocation16_spill]] }
 0x455   : > { %916 = vrot.lane.b32.xlu0 %v2386_v26, %s2161_s29  ;;  %s2593_s29 = scalar_lea.vmem %s2592_s22, %s2288_s28 }
 0x459   : > { %1253 = vrot.lane.b32.xlu0 %v2386_v26, %s2162_s25 }
 0x46c   : > { %1248 = vadd.xlane.f32.xlu1 %v1247_v32 }
 0x47d   : > { %1141 = vrot.lane.b32.xlu1 %v2386_v26, %s2163_s19 }
 0x4c0   : > { %v912_v33 = vpop.xlane.xlu0 %911 }
 0x4c1   : > { %2097 = vrcp.f32 %v912_v33 }
 0x4c4   : > { %v1025_v34 = vpop.xlane.xlu1 %1024 }
 0x4c5   : > { %2099 = vrcp.f32 %v1025_v34  ;;  %v2080_v34 = vld [vmem:[%s2328_s3 + $0x8] sm:$0xff]  }
 0x4c8   : > { %v1030_v40 = vpop.permute.xlu1 %1029 }
 0x4c9   : > { %v1035_v43 = vsel %vm921_vm5, %v1030_v40, 0  ;;  %v1867_v40 = vld [vmem:[%s2590_s4] ss:$0 sm:$0xff] }
 0x4cb   : > { %v2098_v35 = vpop.eup %2097 }
 0x4cc   : > { %v1137_v36 = vpop.xlane.xlu0 %1136  ;;  %v914_v37 = vmul.f32 %v2098_v35, %v2090_v19  ;;  %v774_v19 = vunpack.c.l.bf16 %v2374_v20  ;;  %v2079_v20 = vld [vmem:[%s2328_s3] sm:$0xff]  }
 0x4cd   : > { %2101 = vrcp.f32 %v1137_v36  ;;  %v2081_v35 = vld [vmem:[%s2342_s20] sm:$0xff]  }
 0x4ce   : > { %v915_v41 = vpack.c.bf16 %v914_v37, %v914_v37 }
 0x4cf   : > { %v2100_v42 = vpop.eup %2099 }
 0x4d0   : > { %v917_v38 = vpop.permute.xlu0 %916  ;;  %v1027_v26 = vmul.f32 %v2100_v42, %v2092_v23  ;;  %v1868_v42 = vld [vmem:[%s2591_s21] ss:$0 sm:$0xff] }
 0x4d1   : > { %v923_v39 = vsel %vm921_vm5, %v917_v38, 0 }
 0x4d2   : > { %1940 = vmatpush3.bf16.msra.mxu0 %v923_v39  ;;  %v1028_v44 = vpack.c.bf16 %v1027_v26, %v1027_v26 }
 0x4d3   : > { %1951 = vmatprep.subr.bf16.mxu0 %v2151_v18 }
 0x4d4   : > { %v1254_v50 = vpop.permute.xlu0 %1253 }
 0x4d5   : > { %1942 = vmatmul.mubr.msk.bf16.vlgmr.msra.gmra.mrb[8].mxu0 %vm849_vm4, %v915_v41  ;;  %v1259_v52 = vsel %vm921_vm5, %v1254_v50, 0  ;;  %v2087_v50 = vld [vmem:[%s2342_s20 + $0x30] sm:$0xff]  }
 0x4d6   : > { %1952 = vmatpush3.bf16.msra.mxu0 %v1035_v43  ;;  %1953 = vmatprep.mubr.msk.bf16.mxu0 %vm2152_vm2, %v2151_v18 }
 0x4d7   : > { %1963 = vmatprep.subr.bf16.mxu0 %v2151_v18  ;;  %v2102_v45 = vpop.eup %2101 }
 0x4d8   : > { %v1139_v47 = vmul.f32 %v2102_v45, %v2094_v25  ;;  %v2082_v45 = vld [vmem:[%s2342_s20 + $0x8] sm:$0xff]  }
 0x4da   : > { %v1140_v51 = vpack.c.bf16 %v1139_v47, %v1139_v47  ;;  %v2084_v47 = vld [vmem:[%s2342_s20 + $0x18] sm:$0xff]  }
 0x4dd   : > { %1954 = vmatmul.mubr.msk.bf16.vlgmr.msra.gmra.mrb[12].mxu0 %vm849_vm4, %v1028_v44 }
 0x4de   : > { %1965 = vmatprep.mubr.msk.bf16.mxu0 %vm2152_vm2, %v2151_v18 }
 0x4f9   : > { %v1249_v46 = vpop.xlane.xlu1 %1248 }
 0x4fa   : > { %2103 = vrcp.f32 %v1249_v46  ;;  %v2083_v46 = vld [vmem:[%s2342_s20 + $0x10] sm:$0xff]  }
 0x4fd   : > { %v1142_v48 = vpop.permute.xlu1 %1141 }
 0x4fe   : > { %v1147_v49 = vsel %vm921_vm5, %v1142_v48, 0  ;;  %v2085_v48 = vld [vmem:[%s2342_s20 + $0x20] sm:$0xff]  }
 0x4ff   : > { %1964 = vmatpush3.bf16.msra.mxu0 %v1147_v49  ;;  %v2086_v49 = vld [vmem:[%s2342_s20 + $0x28] sm:$0xff]  }
 0x500   : > { %1975 = vmatprep.subr.bf16.mxu0 %v2151_v18 }
 0x502   : > { %1966 = vmatmul.mubr.msk.bf16.vlgmr.msra.gmra.mrb[16].mxu0 %vm849_vm4, %v1140_v51  ;;  %v2088_v51 = vld [vmem:[%s2342_s20 + $0x38] sm:$0xff]  }
 0x503   : > { %1976 = vmatpush3.bf16.msra.mxu0 %v1259_v52  ;;  %1977 = vmatprep.mubr.msk.bf16.mxu0 %vm2152_vm2, %v2151_v18  ;;  %v1869_v52 = vld [vmem:[%s2593_s29] ss:$0 sm:$0xff] }
 0x504   : > { %v2104_v53 = vpop.eup %2103  ;;  %1989 = vmatprep.subr.bf16.mxu0 %v2151_v18 }
 0x505   : > { %v1251_v54 = vmul.f32 %v2104_v53, %v2096_v31 }
 0x507   : > { %v1252_v55 = vpack.c.bf16 %v1251_v54, %v1251_v54 }
 0x50a   : > { %1978 = vmatmul.mubr.msk.bf16.vlgmr.msra.gmra.mrb[20].mxu0 %vm849_vm4, %v1252_v55 }
 0x50b   : > { %1993 = vmatprep.mubr.msk.bf16.mxu0 %vm2152_vm2, %v2151_v18  ;;  %1990 = vmatpush3.bf16.msra.mxu0 %v2079_v20 }
 0x50c   : > { %1991 = vmatprep.subr.bf16.mxu0 %v2151_v18 }
 0x50f   : > { %1992 = vmatpush3.bf16.msra.mxu0 %v2080_v34 }
 0x5a8   : > { %v959_v56 = vpop.f32.mrb[8].mxu0 }
 0x5a9   : > { %v1943_v57 = vpop.f32.mrb[9].mxu0 }
 0x5aa   : > { %v962_v58 = vpop.f32.mrb[10].mxu0 }
 0x5ab   : > { %v1944_v59 = vpop.f32.mrb[11].mxu0 }
 0x5b0   : > { %v1071_v60 = vpop.f32.mrb[12].mxu0 }
 0x5b1   : > { %1302 = vrot.lane.b32.xlu1 %v1071_v60, %s2164_s23  ;;  %v1955_v61 = vpop.f32.mrb[13].mxu0 }
 0x5b2   : > { %v1074_v62 = vpop.f32.mrb[14].mxu0 }
 0x5b3   : > { %v1956_v63 = vpop.f32.mrb[15].mxu0 }
 0x5d5   : > { %v1183_v2 = vpop.f32.mrb[16].mxu0 }
 0x5d6   : > { %1306 = vrot.lane.b32.xlu0 %v1183_v2, %s2165_s24  ;;  %v1967_v3 = vpop.f32.mrb[17].mxu0 }
 0x5d7   : > { %v1186_v4 = vpop.f32.mrb[18].mxu0  ;;  %v1873_v3 = vld [vmem:[%s723_s18] ss:$0 sm:$0xff] }
 0x5d8   : > { %v1968_v5 = vpop.f32.mrb[19].mxu0 }
 0x5dd   : > { %v1295_v6 = vpop.f32.mrb[20].mxu0 }
 0x5de   : > { %1310 = vrot.lane.b32.xlu1 %v1295_v6, %s2166_s26  ;;  %v1979_v7 = vpop.f32.mrb[21].mxu0 }
 0x5df   : > { %v1298_v8 = vpop.f32.mrb[22].mxu0 }
 0x5e0   : > { %v1980_v9 = vpop.f32.mrb[23].mxu0 }
 0x623   : > { %v1303_v10 = vpop.permute.xlu1 %1302 }
 0x624   : > { %v1313_v12 = vsel %vm849_vm4, %v959_v56, %v1303_v10 }
 0x648   : > { %v1307_v11 = vpop.permute.xlu0 %1306 }
 0x649   : > { %v1315_v13 = vsel %vm1314_vm6, %v1313_v12, %v1307_v11 }
 0x650   : > { %v1311_v14 = vpop.permute.xlu1 %1310 }
 0x651   : > { %v1317_v15 = vsel %vm1316_vm7, %v1315_v13, %v1311_v14 }
 0x652   : > { %v1318_v16 = vpack.c.bf16 %v1317_v15, %v1317_v15 }
 0x654   : > { %1986 = vmatmul.mubr.msk.bf16.vlgmr.msra.gmra.mrb[12].mxu1 %vm798_vm3, %v1318_v16 }
 0x655   : > { %2013 = vmatprep.mubr.msk.bf16.mxu1 %vm2152_vm2, %v2151_v18  ;;  %1998 = vmatpush3.bf16.msra.mxu1 %v2081_v35 }
 0x656   : > { %1999 = vmatprep.subr.bf16.mxu1 %v2151_v18 }
 0x659   : > { %2000 = vmatpush3.bf16.msra.mxu1 %v2082_v45 }
 0x65a   : > { %2001 = vmatprep.subr.bf16.mxu1 %v2151_v18 }
 0x65d   : > { %2002 = vmatpush3.bf16.msra.mxu1 %v2083_v46 }
 0x65e   : > { %2003 = vmatprep.subr.bf16.mxu1 %v2151_v18 }
 0x661   : > { %2004 = vmatpush3.bf16.msra.mxu1 %v2084_v47 }
 0x662   : > { %2005 = vmatprep.subr.bf16.mxu1 %v2151_v18 }
 0x665   : > { %2006 = vmatpush3.bf16.msra.mxu1 %v2085_v48 }
 0x666   : > { %2007 = vmatprep.subr.bf16.mxu1 %v2151_v18 }
 0x669   : > { %2008 = vmatpush3.bf16.msra.mxu1 %v2086_v49 }
 0x66a   : > { %2009 = vmatprep.subr.bf16.mxu1 %v2151_v18 }
 0x66d   : > { %2010 = vmatpush3.bf16.msra.mxu1 %v2087_v50 }
 0x66e   : > { %2011 = vmatprep.subr.bf16.mxu1 %v2151_v18 }
 0x671   : > { %2012 = vmatpush3.bf16.msra.mxu1 %v2088_v51 }
 0x727   : > { %v1379_v21 = vpop.f32.mrb[12].mxu1 }
 0x728   : > { %v1380_v22 = vadd.f32 %v1863_v17, %v1379_v21  ;;  %v1987_v23 = vpop.f32.mrb[13].mxu1 }
 0x729   : > { %v1382_v24 = vpop.f32.mrb[14].mxu1 }
 0x72a   : > { %v1988_v25 = vpop.f32.mrb[15].mxu1  ;;  %v1385_v27 = vadd.f32 %v1380_v22, %v774_v19  ;;  %v1882_v22 = vld [vmem:[%s726_s1] ss:$0 sm:$0xff] }
 0x72b   : > { %v1883_v24 = vld [vmem:[%s729_s10] ss:$0 sm:$0xff] }
 0x72c   : > { %v1388_v28 = vsel %vm798_vm3, %v1385_v27, 0.0 }
 0x72d   : > { %1389 = vadd.xlane.f32.xlu0 %v1388_v28 }
 0x7ba   : > { %v1390_v29 = vpop.xlane.xlu0 %1389 }
 0x7bb   : > { %v1392_v30 = vmul.f32 0.03125, %v1390_v29  ;;  %v1644_v29 = vld [vmem:[%s2356_s11] sm:$0x1] (!%p1884_p8) }
 0x7bd   : > { %v1393_v31 = vsub.f32 %v1385_v27, %v1392_v30 }
 0x7bf   : > { %v1394_v32 = vmul.f32 %v1393_v31, %v1393_v31 }
 0x7c1   : > { %v1395_v33 = vsel %vm798_vm3, %v1394_v32, 0.0 }
 0x7c2   : > { %1396 = vadd.xlane.f32.xlu1 %v1395_v33 }
 0x84f   : > { %v1397_v36 = vpop.xlane.xlu1 %1396 }
 0x850   : > { %v1398_v37 = vmul.f32 0.03125, %v1397_v36 }
 0x852   : > { %v1399_v38 = vadd.f32 1e-12, %v1398_v37 }
 0x854   : > { %2105 = vrsqrt.f32 %v1399_v38 }
 0x85e   : > { %v2106_v39 = vpop.eup %2105 }
 0x85f   : > { %v1401_v41 = vmul.f32 %v2106_v39, %v1393_v31 }
 0x861   : > { %v1408_v43 = vmul.f32 %v1867_v40, %v1401_v41 }
 0x863   : > { %v1415_v26 = vadd.f32 %v1868_v42, %v1408_v43 }
 0x865   : > { %v1416_v44 = vpack.c.bf16 %v1415_v26, %v1415_v26 }
 0x867   : > { %1994 = vmatmul.mubr.msk.bf16.vlgmr.msra.gmra.mrb[24].mxu0 %vm798_vm3, %v1416_v44 }
 0x93a   : > { %v1477_v53 = vpop.f32.mrb[24].mxu0 }
 0x93b   : > { %v1478_v54 = vadd.f32 %v1869_v52, %v1477_v53  ;;  %v1995_v55 = vpop.f32.mrb[25].mxu0 }
 0x93c   : > { %v1480_v56 = vpop.f32.mrb[26].mxu0 }
 0x93d   : > { %v1484_v57 = vmul.f32 0.044715, %v1478_v54  ;;  %v1996_v58 = vpop.f32.mrb[27].mxu0  ;;  %v1483_v18 = vmul.f32 0.5, %v1478_v54 }
 0x93f   : > { %v1485_v59 = vmul.f32 %v1484_v57, %v1478_v54 }
 0x941   : > { %v1486_v60 = vmul.f32 %v1485_v59, %v1478_v54 }
 0x943   : > { %v1487_v61 = vadd.f32 %v1486_v60, %v1478_v54 }
 0x945   : > { %v1488_v62 = vmul.f32 0.7978846, %v1487_v61 }
 0x947   : > { %2107 = vtanh.f32 %v1488_v62 }
 0x951   : > { %v2108_v63 = vpop.eup %2107 }
 0x952   : > { %v1490_v0 = vadd.f32 1.0, %v2108_v63 }
 0x954   : > { %v1491_v1 = vmul.f32 %v1490_v0, %v1483_v18 }
 0x956   : > { %v1492_v2 = vpack.c.bf16 %v1491_v1, %v1491_v1 }
 0x958   : > { %2014 = vmatmul.mubr.bf16.vlgmr.msra.gmra.mrb[16].mxu1 %v1492_v2 }
 0xa2b   : > { %v1598_v4 = vpop.f32.mrb[16].mxu1 }
 0xa2c   : > { %v1599_v5 = vadd.f32 %v1873_v3, %v1598_v4  ;;  %v2015_v6 = vpop.f32.mrb[17].mxu1 }
 0xa2d   : > { %v1601_v7 = vpop.f32.mrb[18].mxu1 }
 0xa2e   : > { %v2016_v8 = vpop.f32.mrb[19].mxu1  ;;  %v1604_v9 = vadd.f32 %v1599_v5, %v1415_v26 }
 0xa30   : > { %v1607_v10 = vsel %vm798_vm3, %v1604_v9, 0.0 }
 0xa31   : > { %1608 = vadd.xlane.f32.xlu0 %v1607_v10 }
 0xabe   : > { %v1609_v11 = vpop.xlane.xlu0 %1608 }
 0xabf   : > { %v1610_v12 = vmul.f32 0.03125, %v1609_v11 }
 0xac1   : > { %v1611_v13 = vsub.f32 %v1604_v9, %v1610_v12 }
 0xac3   : > { %v1612_v14 = vmul.f32 %v1611_v13, %v1611_v13 }
 0xac5   : > { %v1613_v15 = vsel %vm798_vm3, %v1612_v14, 0.0 }
 0xac6   : > { %1614 = vadd.xlane.f32.xlu0 %v1613_v15 }
 0xb53   : > { %v1615_v16 = vpop.xlane.xlu0 %1614 }
 0xb54   : > { %v1616_v17 = vmul.f32 0.03125, %v1615_v16 }
 0xb56   : > { %v1617_v19 = vadd.f32 1e-12, %v1616_v17 }
 0xb58   : > { %2109 = vrsqrt.f32 %v1617_v19 }
 0xb62   : > { %v2110_v21 = vpop.eup %2109 }
 0xb63   : > { %v1619_v23 = vmul.f32 %v2110_v21, %v1611_v13 }
 0xb65   : > { %v1626_v25 = vmul.f32 %v1882_v22, %v1619_v23  ;;  %1640 = sbr.rel (%p1884_p8) target bundleno = 2925 (0xb6d), region = 92 }
 0xb67   : > { %v1633_v27 = vadd.f32 %v1883_v24, %v1626_v25 }
 0xb69   : > { %v1634_v28 = vpack.c.bf16 %v1633_v27, %v1633_v27 }
 0xb6b   : > { %1636 = vst.msk [vmem:[#allocation2] sm:$0xf] %vm1635_vm8, %v1634_v28  ;;  %v1645_v30 = vsel (!%p1884_p8), %vm1643_vm11, %v1634_v28, %v1644_v29 }
 0xb6c   : > { %1646 = vst [vmem:[%s2356_s11] sm:$0x1] %v1645_v30 }
 0xb6d PF: > { %s2596_s28 = sld [smem:[#allocation6_spill]]  ;;  %s2597_s21 = sld [smem:[#allocation4_spill]] }
 0xb6e   : > { %s2598_s22 = sld [smem:[#allocation5_spill]]  ;;  %s2599_s23 = sld [smem:[#allocation7_spill]] }
 0xb6f   : > { %s2600_s24 = sld [smem:[#allocation8_spill]] }
 0xb73   : > { %s26_s25 = sadd.s32 1, %s2596_s28  }
 0xb74   : > { %p23_p9 = scmp.ge.s32.totalorder %s26_s25, 6  }
 0xb76   :  { %25 = sbr.rel (!%p23_p9) target bundleno = 11 (0xb), region = 161 }

</bundles_post_ra>
